<compile_context>
chip_gen: v6e
topology: v6e:2x2x1
jax: 0.10.0
libtpu: 0.0.40
codegen_flags: <defaults>
</compile_context>

<pallas_src>
import functools

import jax
import jax.numpy as jnp
from jax.experimental import pallas as pl
from jax.experimental.pallas import tpu as pltpu


def _sanode_kernel(x_ref, w_ref, ball_ref, w3dt_ref, traj_ref, *, n_steps, data_dim):
    # x_ref:    (D, TB)           initial condition (batch on lanes)
    # w_ref:    (2H, D)           packed [fc1_time_1.weight ; fc1_time_2.weight]
    # ball_ref: (2H, n_steps)     precomputed biases b(t_k) = t_k*wb + bb (one column/step)
    # w3dt_ref: (D, 2H)           dt * blockdiag(fc3_time_1.weight, fc3_time_2.weight)
    # traj_ref: (n_steps*D, TB)   flattened Euler states at t = dt .. T
    x = x_ref[...]                 # (D, TB)
    w = w_ref[...]                 # (2H, D)
    b_all = ball_ref[...]          # (2H, n_steps)
    w3dt = w3dt_ref[...]           # (D, 2H)

    # Hoisted (2H, 1) weight columns for the VPU form of the first layer.
    w0c = w[:, 0:1]
    w1c = w[:, 1:2]

    # Fully unrolled Euler loop (n_steps is static and small): static traj
    # store offsets and full cross-step scheduler visibility.
    for k in range(n_steps):
        b_k = b_all[:, k:k + 1]                                  # (2H, 1)
        # First layer as VPU FMAs: a (2H,2)x(2,TB) matmul would waste the MXU
        # and add a push+pop latency to every link of the serial Euler chain.
        # Bias is folded into the same chain (no separate broadcast+add pass).
        pre = w1c * x[1:2, :] + b_k                              # (2H, TB)
        pre = pre + w0c * x[0:1, :]                              # (2H, TB)
        h = jnp.tanh(pre)                                        # EUP
        # Second projection (K=2H) stays on the MXU.
        # TODO(synk): optionally move to an XLU cross-sublane reduction on
        # v6e/v7x (M=2 uses only 2 MXU result rows) -- profile-guided.
        x = x + jnp.dot(w3dt, h, preferred_element_type=jnp.float32)   # (D, TB)
        traj_ref[pl.ds(data_dim * k, data_dim), :] = x


_MAX_LANE_TILE = 1024   # review sweep {512, 1024, 2048}; keep <= 1024 for v5e.


def sanode_forward(u, params, *, T, time_steps, traj_batch_major=True):
    """Returns (features, traj) matching SANODE.forward semantics.

    traj_batch_major=True  -> traj shape (time_steps-1, B, D) (module layout).
    traj_batch_major=False -> traj shape (time_steps-1, D, B) (kernel-native;
                              skips one extra full-HBM transpose pass).
    """
    n_steps = time_steps - 1
    dt = float(T) / float(n_steps)
    B, D = u.shape
    H = params["w1"].shape[0]
    assert D == 2, "SANODE dynamics produce 2-D derivatives; data_dim must be 2."

    # ---- parameter packing (pure JAX, one-time, off the serial critical path) ----
    # Fused first-layer weight: (2H, D)
    w_packed = jnp.concatenate([params["w1"], params["w2"]], axis=0)
    # Time-dependent biases for every Euler step: b(t_k) = t_k*wb + bb, (2H, n_steps)
    wb = jnp.concatenate(
        [params["wb1"].reshape(H), params["wb2"].reshape(H)], axis=0)       # (2H,)
    bb = jnp.concatenate([params["bb1"], params["bb2"]], axis=0)            # (2H,)
    t_vals = jnp.asarray([k * dt for k in range(n_steps)], jnp.float32)     # (n_steps,)
    b_all = wb[:, None] * t_vals[None, :] + bb[:, None]                     # (2H, n_steps)
    # Block-diagonal output projection with dt folded in: (D, 2H)
    w31 = params["w31"].reshape(H)
    w32 = params["w32"].reshape(H)
    zeros = jnp.zeros((H,), jnp.float32)
    w3dt = jnp.float32(dt) * jnp.stack(
        [jnp.concatenate([w31, zeros]), jnp.concatenate([zeros, w32])], axis=0)

    # ---- batch tiling: batch lives on the lane axis inside the kernel ----
    xT = u.T                                                                # (D, B)
    if B <= _MAX_LANE_TILE:
        TB = B                      # one block; block dims equal full array dims
        B_pad = B
    else:
        TB = _MAX_LANE_TILE         # lane-dense tiles; pad B instead of TB=B fallback
        B_pad = ((B + TB - 1) // TB) * TB
        if B_pad != B:
            xT = jnp.pad(xT, ((0, 0), (0, B_pad - B)))
    grid = (B_pad // TB,)

    kernel = functools.partial(_sanode_kernel, n_steps=n_steps, data_dim=D)
    traj_flat = pl.pallas_call(
        kernel,
        out_shape=jax.ShapeDtypeStruct((n_steps * D, B_pad), jnp.float32),
        grid_spec=pltpu.PrefetchScalarGridSpec(
            num_scalar_prefetch=0,
            grid=grid,
            in_specs=[
                pl.BlockSpec((D, TB), lambda i: (0, i)),
                pl.BlockSpec((2 * H, D), lambda i: (0, 0)),
                pl.BlockSpec((2 * H, n_steps), lambda i: (0, 0)),
                pl.BlockSpec((D, 2 * H), lambda i: (0, 0)),
            ],
            out_specs=pl.BlockSpec((n_steps * D, TB), lambda i: (0, i)),
        ),
        compiler_params=pltpu.CompilerParams(
            dimension_semantics=("parallel",)),
    )(xT, w_packed, b_all, w3dt)

    # features == state at t = T (last stored step); slice padding off.
    feat = traj_flat[D * (n_steps - 1):D * n_steps, :B].T                   # (B, D)
    # (n_steps*D, B) -> (n_steps, D, B) is a free contiguous reshape.
    traj_db = traj_flat[:, :B].reshape(n_steps, D, B)
    if traj_batch_major:
        traj = jnp.transpose(traj_db, (0, 2, 1))                            # (steps, B, D)
    else:
        traj = traj_db                                                      # (steps, D, B)
    return feat, traj


def sanode_reference(u, params, *, T, time_steps):
    """Pure-JAX reference implementing the same Euler integration."""
    n_steps = time_steps - 1
    dt = float(T) / float(n_steps)
    w1, w2 = params["w1"], params["w2"]
    wb1, wb2 = params["wb1"].reshape(-1), params["wb2"].reshape(-1)
    bb1, bb2 = params["bb1"], params["bb2"]
    w31, w32 = params["w31"], params["w32"]

    hp = jax.lax.Precision.HIGHEST
    x = u
    traj = []
    for k in range(n_steps):
        t = k * dt
        b1 = t * wb1 + bb1
        b2 = t * wb2 + bb2
        h1 = jnp.tanh(jnp.dot(x, w1.T, precision=hp) + b1)
        h2 = jnp.tanh(jnp.dot(x, w2.T, precision=hp) + b2)
        d1 = jnp.dot(h1, w31.T, precision=hp)
        d2 = jnp.dot(h2, w32.T, precision=hp)
        dx = jnp.concatenate([d1, d2], axis=1)
        x = x + dt * dx
        traj.append(x)
    return x, jnp.stack(traj, axis=0)


if __name__ == "__main__":
    # Small shapes consistent with the module: data_dim == output_dim == 2.
    B, D, H = 8, 2, 32
    T, time_steps = 10, 10

    key = jax.random.PRNGKey(0)
    ks = jax.random.split(key, 8)

    def xavier_normal(k, shape):
        fan_out, fan_in = shape
        std = (2.0 / (fan_in + fan_out)) ** 0.5
        return std * jax.random.normal(k, shape, dtype=jnp.float32)

    params = {
        "w1": xavier_normal(ks[0], (H, D)),    # fc1_time_1.weight
        "w2": xavier_normal(ks[1], (H, D)),    # fc1_time_2.weight
        "wb1": xavier_normal(ks[2], (H, 1)),   # b_time_1.weight
        "wb2": xavier_normal(ks[3], (H, 1)),   # b_time_2.weight
        "w31": xavier_normal(ks[4], (1, H)),   # fc3_time_1.weight
        "w32": xavier_normal(ks[5], (1, H)),   # fc3_time_2.weight
        "bb1": jnp.zeros((H,), jnp.float32),   # b_time_1.bias (zeros_)
        "bb2": jnp.zeros((H,), jnp.float32),   # b_time_2.bias (zeros_)
    }
    u = jax.random.normal(ks[6], (B, D), dtype=jnp.float32)

    # Primary (small) case: single lane tile.
    feat, traj = sanode_forward(u, params, T=T, time_steps=time_steps)
    jax.block_until_ready((feat, traj))

    feat_ref, traj_ref = sanode_reference(u, params, T=T, time_steps=time_steps)
    assert feat.shape == (B, D) and traj.shape == (time_steps - 1, B, D)
    assert jnp.allclose(feat, feat_ref, atol=1e-4, rtol=1e-4)
    assert jnp.allclose(traj, traj_ref, atol=1e-4, rtol=1e-4)
    assert jnp.allclose(feat, traj[-1], atol=1e-6)

    # Padded / multi-tile grid path: B > lane tile and not a multiple of 128.
    B2 = 1100
    u2 = jax.random.normal(ks[7], (B2, D), dtype=jnp.float32)
    feat2, traj2 = sanode_forward(u2, params, T=T, time_steps=time_steps)
    jax.block_until_ready((feat2, traj2))

    feat2_ref, traj2_ref = sanode_reference(u2, params, T=T, time_steps=time_steps)
    assert feat2.shape == (B2, D) and traj2.shape == (time_steps - 1, B2, D)
    assert jnp.allclose(feat2, feat2_ref, atol=1e-4, rtol=1e-4)
    assert jnp.allclose(traj2, traj2_ref, atol=1e-4, rtol=1e-4)

    print("KERNEL_OK")
</pallas_src>

<mosaic_0001>
module attributes {stable_mosaic.version = 11 : i64} {
  func.func @_sanode_kernel(%arg0: i32, %arg1: memref<2x8xf32, #tpu.memory_space<vmem>>, %arg2: memref<64x2xf32, #tpu.memory_space<vmem>>, %arg3: memref<64x9xf32, #tpu.memory_space<vmem>>, %arg4: memref<2x64xf32, #tpu.memory_space<vmem>>, %arg5: memref<18x8xf32, #tpu.memory_space<vmem>>) attributes {dimension_semantics = [#tpu.dimension_semantics<parallel>], iteration_bounds = array<i64: 1>, scalar_prefetch = 0 : i64, scratch_operands = 0 : i64, tpu.core_type = #tpu.core_type<tc>, window_params = [{transform_indices = @transform_0, window_bounds = array<i64: 2, 8>}, {pipeline_mode = #tpu.pipeline_mode<synchronous>, transform_indices = @transform_1, window_bounds = array<i64: 64, 2>}, {pipeline_mode = #tpu.pipeline_mode<synchronous>, transform_indices = @transform_2, window_bounds = array<i64: 64, 9>}, {pipeline_mode = #tpu.pipeline_mode<synchronous>, transform_indices = @transform_3, window_bounds = array<i64: 2, 64>}, {transform_indices = @transform_4, window_bounds = array<i64: 18, 8>}]} {
    %c0 = arith.constant 0 : index
    %c0_0 = arith.constant 0 : index
    %0 = vector.load %arg1[%c0, %c0_0] : memref<2x8xf32, #tpu.memory_space<vmem>>, vector<2x8xf32>
    %c0_1 = arith.constant 0 : index
    %c0_2 = arith.constant 0 : index
    %1 = vector.load %arg2[%c0_1, %c0_2] : memref<64x2xf32, #tpu.memory_space<vmem>>, vector<64x2xf32>
    %c0_3 = arith.constant 0 : index
    %c0_4 = arith.constant 0 : index
    %2 = vector.load %arg3[%c0_3, %c0_4] : memref<64x9xf32, #tpu.memory_space<vmem>>, vector<64x9xf32>
    %c0_5 = arith.constant 0 : index
    %c0_6 = arith.constant 0 : index
    %3 = vector.load %arg4[%c0_5, %c0_6] : memref<2x64xf32, #tpu.memory_space<vmem>>, vector<2x64xf32>
    %4 = vector.extract_strided_slice %1 {offsets = [0, 0], sizes = [64, 1], strides = [1, 1]} : vector<64x2xf32> to vector<64x1xf32>
    %5 = vector.extract_strided_slice %1 {offsets = [0, 1], sizes = [64, 1], strides = [1, 1]} : vector<64x2xf32> to vector<64x1xf32>
    %6 = vector.extract_strided_slice %2 {offsets = [0, 0], sizes = [64, 1], strides = [1, 1]} : vector<64x9xf32> to vector<64x1xf32>
    %7 = vector.extract_strided_slice %0 {offsets = [1, 0], sizes = [1, 8], strides = [1, 1]} : vector<2x8xf32> to vector<1x8xf32>
    %8 = vector.broadcast %5 : vector<64x1xf32> to vector<64x8xf32>
    %9 = vector.broadcast %7 : vector<1x8xf32> to vector<64x8xf32>
    %10 = arith.mulf %8, %9 : vector<64x8xf32>
    %11 = vector.broadcast %6 : vector<64x1xf32> to vector<64x8xf32>
    %12 = arith.addf %10, %11 : vector<64x8xf32>
    %13 = vector.extract_strided_slice %0 {offsets = [0, 0], sizes = [1, 8], strides = [1, 1]} : vector<2x8xf32> to vector<1x8xf32>
    %14 = vector.broadcast %4 : vector<64x1xf32> to vector<64x8xf32>
    %15 = vector.broadcast %13 : vector<1x8xf32> to vector<64x8xf32>
    %16 = arith.mulf %14, %15 : vector<64x8xf32>
    %17 = arith.addf %12, %16 : vector<64x8xf32>
    %18 = math.tanh %17 : vector<64x8xf32>
    %cst = arith.constant dense<0.000000e+00> : vector<2x8xf32>
    %19 = tpu.matmul %3, %18, %cst {dimension_numbers = #tpu.dot_dimension_numbers<[1], [0], [0], [1], [0, 0, 1, 1], [], []>} : vector<2x64xf32>, vector<64x8xf32>, vector<2x8xf32> -> vector<2x8xf32>
    %20 = arith.addf %0, %19 : vector<2x8xf32>
    %c0_7 = arith.constant 0 : index
    %c0_8 = arith.constant 0 : index
    %21 = vector.load %arg5[%c0_7, %c0_8] : memref<18x8xf32, #tpu.memory_space<vmem>>, vector<2x8xf32>
    tpu.vector_store %arg5[%c0_7, %c0_8], %20 {strides = array<i32>} : memref<18x8xf32, #tpu.memory_space<vmem>>, vector<2x8xf32>,
    %22 = vector.extract_strided_slice %2 {offsets = [0, 1], sizes = [64, 1], strides = [1, 1]} : vector<64x9xf32> to vector<64x1xf32>
    %23 = vector.extract_strided_slice %20 {offsets = [1, 0], sizes = [1, 8], strides = [1, 1]} : vector<2x8xf32> to vector<1x8xf32>
    %24 = vector.broadcast %5 : vector<64x1xf32> to vector<64x8xf32>
    %25 = vector.broadcast %23 : vector<1x8xf32> to vector<64x8xf32>
    %26 = arith.mulf %24, %25 : vector<64x8xf32>
    %27 = vector.broadcast %22 : vector<64x1xf32> to vector<64x8xf32>
    %28 = arith.addf %26, %27 : vector<64x8xf32>
    %29 = vector.extract_strided_slice %20 {offsets = [0, 0], sizes = [1, 8], strides = [1, 1]} : vector<2x8xf32> to vector<1x8xf32>
    %30 = vector.broadcast %4 : vector<64x1xf32> to vector<64x8xf32>
    %31 = vector.broadcast %29 : vector<1x8xf32> to vector<64x8xf32>
    %32 = arith.mulf %30, %31 : vector<64x8xf32>
    %33 = arith.addf %28, %32 : vector<64x8xf32>
    %34 = math.tanh %33 : vector<64x8xf32>
    %cst_9 = arith.constant dense<0.000000e+00> : vector<2x8xf32>
    %35 = tpu.matmul %3, %34, %cst_9 {dimension_numbers = #tpu.dot_dimension_numbers<[1], [0], [0], [1], [0, 0, 1, 1], [], []>} : vector<2x64xf32>, vector<64x8xf32>, vector<2x8xf32> -> vector<2x8xf32>
    %36 = arith.addf %20, %35 : vector<2x8xf32>
    %c2 = arith.constant 2 : index
    %c0_10 = arith.constant 0 : index
    %37 = vector.load %arg5[%c2, %c0_10] : memref<18x8xf32, #tpu.memory_space<vmem>>, vector<2x8xf32>
    tpu.vector_store %arg5[%c2, %c0_10], %36 {strides = array<i32>} : memref<18x8xf32, #tpu.memory_space<vmem>>, vector<2x8xf32>,
    %38 = vector.extract_strided_slice %2 {offsets = [0, 2], sizes = [64, 1], strides = [1, 1]} : vector<64x9xf32> to vector<64x1xf32>
    %39 = vector.extract_strided_slice %36 {offsets = [1, 0], sizes = [1, 8], strides = [1, 1]} : vector<2x8xf32> to vector<1x8xf32>
    %40 = vector.broadcast %5 : vector<64x1xf32> to vector<64x8xf32>
    %41 = vector.broadcast %39 : vector<1x8xf32> to vector<64x8xf32>
    %42 = arith.mulf %40, %41 : vector<64x8xf32>
    %43 = vector.broadcast %38 : vector<64x1xf32> to vector<64x8xf32>
    %44 = arith.addf %42, %43 : vector<64x8xf32>
    %45 = vector.extract_strided_slice %36 {offsets = [0, 0], sizes = [1, 8], strides = [1, 1]} : vector<2x8xf32> to vector<1x8xf32>
    %46 = vector.broadcast %4 : vector<64x1xf32> to vector<64x8xf32>
    %47 = vector.broadcast %45 : vector<1x8xf32> to vector<64x8xf32>
    %48 = arith.mulf %46, %47 : vector<64x8xf32>
    %49 = arith.addf %44, %48 : vector<64x8xf32>
    %50 = math.tanh %49 : vector<64x8xf32>
    %cst_11 = arith.constant dense<0.000000e+00> : vector<2x8xf32>
    %51 = tpu.matmul %3, %50, %cst_11 {dimension_numbers = #tpu.dot_dimension_numbers<[1], [0], [0], [1], [0, 0, 1, 1], [], []>} : vector<2x64xf32>, vector<64x8xf32>, vector<2x8xf32> -> vector<2x8xf32>
    %52 = arith.addf %36, %51 : vector<2x8xf32>
    %c4 = arith.constant 4 : index
    %c0_12 = arith.constant 0 : index
    %53 = vector.load %arg5[%c4, %c0_12] : memref<18x8xf32, #tpu.memory_space<vmem>>, vector<2x8xf32>
    tpu.vector_store %arg5[%c4, %c0_12], %52 {strides = array<i32>} : memref<18x8xf32, #tpu.memory_space<vmem>>, vector<2x8xf32>,
    %54 = vector.extract_strided_slice %2 {offsets = [0, 3], sizes = [64, 1], strides = [1, 1]} : vector<64x9xf32> to vector<64x1xf32>
    %55 = vector.extract_strided_slice %52 {offsets = [1, 0], sizes = [1, 8], strides = [1, 1]} : vector<2x8xf32> to vector<1x8xf32>
    %56 = vector.broadcast %5 : vector<64x1xf32> to vector<64x8xf32>
    %57 = vector.broadcast %55 : vector<1x8xf32> to vector<64x8xf32>
    %58 = arith.mulf %56, %57 : vector<64x8xf32>
    %59 = vector.broadcast %54 : vector<64x1xf32> to vector<64x8xf32>
    %60 = arith.addf %58, %59 : vector<64x8xf32>
    %61 = vector.extract_strided_slice %52 {offsets = [0, 0], sizes = [1, 8], strides = [1, 1]} : vector<2x8xf32> to vector<1x8xf32>
    %62 = vector.broadcast %4 : vector<64x1xf32> to vector<64x8xf32>
    %63 = vector.broadcast %61 : vector<1x8xf32> to vector<64x8xf32>
    %64 = arith.mulf %62, %63 : vector<64x8xf32>
    %65 = arith.addf %60, %64 : vector<64x8xf32>
    %66 = math.tanh %65 : vector<64x8xf32>
    %cst_13 = arith.constant dense<0.000000e+00> : vector<2x8xf32>
    %67 = tpu.matmul %3, %66, %cst_13 {dimension_numbers = #tpu.dot_dimension_numbers<[1], [0], [0], [1], [0, 0, 1, 1], [], []>} : vector<2x64xf32>, vector<64x8xf32>, vector<2x8xf32> -> vector<2x8xf32>
    %68 = arith.addf %52, %67 : vector<2x8xf32>
    %c6 = arith.constant 6 : index
    %c0_14 = arith.constant 0 : index
    %69 = vector.load %arg5[%c6, %c0_14] : memref<18x8xf32, #tpu.memory_space<vmem>>, vector<2x8xf32>
    tpu.vector_store %arg5[%c6, %c0_14], %68 {strides = array<i32>} : memref<18x8xf32, #tpu.memory_space<vmem>>, vector<2x8xf32>,
    %70 = vector.extract_strided_slice %2 {offsets = [0, 4], sizes = [64, 1], strides = [1, 1]} : vector<64x9xf32> to vector<64x1xf32>
    %71 = vector.extract_strided_slice %68 {offsets = [1, 0], sizes = [1, 8], strides = [1, 1]} : vector<2x8xf32> to vector<1x8xf32>
    %72 = vector.broadcast %5 : vector<64x1xf32> to vector<64x8xf32>
    %73 = vector.broadcast %71 : vector<1x8xf32> to vector<64x8xf32>
    %74 = arith.mulf %72, %73 : vector<64x8xf32>
    %75 = vector.broadcast %70 : vector<64x1xf32> to vector<64x8xf32>
    %76 = arith.addf %74, %75 : vector<64x8xf32>
    %77 = vector.extract_strided_slice %68 {offsets = [0, 0], sizes = [1, 8], strides = [1, 1]} : vector<2x8xf32> to vector<1x8xf32>
    %78 = vector.broadcast %4 : vector<64x1xf32> to vector<64x8xf32>
    %79 = vector.broadcast %77 : vector<1x8xf32> to vector<64x8xf32>
    %80 = arith.mulf %78, %79 : vector<64x8xf32>
    %81 = arith.addf %76, %80 : vector<64x8xf32>
    %82 = math.tanh %81 : vector<64x8xf32>
    %cst_15 = arith.constant dense<0.000000e+00> : vector<2x8xf32>
    %83 = tpu.matmul %3, %82, %cst_15 {dimension_numbers = #tpu.dot_dimension_numbers<[1], [0], [0], [1], [0, 0, 1, 1], [], []>} : vector<2x64xf32>, vector<64x8xf32>, vector<2x8xf32> -> vector<2x8xf32>
    %84 = arith.addf %68, %83 : vector<2x8xf32>
    %c8 = arith.constant 8 : index
    %c0_16 = arith.constant 0 : index
    %85 = vector.load %arg5[%c8, %c0_16] : memref<18x8xf32, #tpu.memory_space<vmem>>, vector<2x8xf32>
    tpu.vector_store %arg5[%c8, %c0_16], %84 {strides = array<i32>} : memref<18x8xf32, #tpu.memory_space<vmem>>, vector<2x8xf32>,
    %86 = vector.extract_strided_slice %2 {offsets = [0, 5], sizes = [64, 1], strides = [1, 1]} : vector<64x9xf32> to vector<64x1xf32>
    %87 = vector.extract_strided_slice %84 {offsets = [1, 0], sizes = [1, 8], strides = [1, 1]} : vector<2x8xf32> to vector<1x8xf32>
    %88 = vector.broadcast %5 : vector<64x1xf32> to vector<64x8xf32>
    %89 = vector.broadcast %87 : vector<1x8xf32> to vector<64x8xf32>
    %90 = arith.mulf %88, %89 : vector<64x8xf32>
    %91 = vector.broadcast %86 : vector<64x1xf32> to vector<64x8xf32>
    %92 = arith.addf %90, %91 : vector<64x8xf32>
    %93 = vector.extract_strided_slice %84 {offsets = [0, 0], sizes = [1, 8], strides = [1, 1]} : vector<2x8xf32> to vector<1x8xf32>
    %94 = vector.broadcast %4 : vector<64x1xf32> to vector<64x8xf32>
    %95 = vector.broadcast %93 : vector<1x8xf32> to vector<64x8xf32>
    %96 = arith.mulf %94, %95 : vector<64x8xf32>
    %97 = arith.addf %92, %96 : vector<64x8xf32>
    %98 = math.tanh %97 : vector<64x8xf32>
    %cst_17 = arith.constant dense<0.000000e+00> : vector<2x8xf32>
    %99 = tpu.matmul %3, %98, %cst_17 {dimension_numbers = #tpu.dot_dimension_numbers<[1], [0], [0], [1], [0, 0, 1, 1], [], []>} : vector<2x64xf32>, vector<64x8xf32>, vector<2x8xf32> -> vector<2x8xf32>
    %100 = arith.addf %84, %99 : vector<2x8xf32>
    %c10 = arith.constant 10 : index
    %c0_18 = arith.constant 0 : index
    %101 = vector.load %arg5[%c10, %c0_18] : memref<18x8xf32, #tpu.memory_space<vmem>>, vector<2x8xf32>
    tpu.vector_store %arg5[%c10, %c0_18], %100 {strides = array<i32>} : memref<18x8xf32, #tpu.memory_space<vmem>>, vector<2x8xf32>,
    %102 = vector.extract_strided_slice %2 {offsets = [0, 6], sizes = [64, 1], strides = [1, 1]} : vector<64x9xf32> to vector<64x1xf32>
    %103 = vector.extract_strided_slice %100 {offsets = [1, 0], sizes = [1, 8], strides = [1, 1]} : vector<2x8xf32> to vector<1x8xf32>
    %104 = vector.broadcast %5 : vector<64x1xf32> to vector<64x8xf32>
    %105 = vector.broadcast %103 : vector<1x8xf32> to vector<64x8xf32>
    %106 = arith.mulf %104, %105 : vector<64x8xf32>
    %107 = vector.broadcast %102 : vector<64x1xf32> to vector<64x8xf32>
    %108 = arith.addf %106, %107 : vector<64x8xf32>
    %109 = vector.extract_strided_slice %100 {offsets = [0, 0], sizes = [1, 8], strides = [1, 1]} : vector<2x8xf32> to vector<1x8xf32>
    %110 = vector.broadcast %4 : vector<64x1xf32> to vector<64x8xf32>
    %111 = vector.broadcast %109 : vector<1x8xf32> to vector<64x8xf32>
    %112 = arith.mulf %110, %111 : vector<64x8xf32>
    %113 = arith.addf %108, %112 : vector<64x8xf32>
    %114 = math.tanh %113 : vector<64x8xf32>
    %cst_19 = arith.constant dense<0.000000e+00> : vector<2x8xf32>
    %115 = tpu.matmul %3, %114, %cst_19 {dimension_numbers = #tpu.dot_dimension_numbers<[1], [0], [0], [1], [0, 0, 1, 1], [], []>} : vector<2x64xf32>, vector<64x8xf32>, vector<2x8xf32> -> vector<2x8xf32>
    %116 = arith.addf %100, %115 : vector<2x8xf32>
    %c12 = arith.constant 12 : index
    %c0_20 = arith.constant 0 : index
    %117 = vector.load %arg5[%c12, %c0_20] : memref<18x8xf32, #tpu.memory_space<vmem>>, vector<2x8xf32>
    tpu.vector_store %arg5[%c12, %c0_20], %116 {strides = array<i32>} : memref<18x8xf32, #tpu.memory_space<vmem>>, vector<2x8xf32>,
    %118 = vector.extract_strided_slice %2 {offsets = [0, 7], sizes = [64, 1], strides = [1, 1]} : vector<64x9xf32> to vector<64x1xf32>
    %119 = vector.extract_strided_slice %116 {offsets = [1, 0], sizes = [1, 8], strides = [1, 1]} : vector<2x8xf32> to vector<1x8xf32>
    %120 = vector.broadcast %5 : vector<64x1xf32> to vector<64x8xf32>
    %121 = vector.broadcast %119 : vector<1x8xf32> to vector<64x8xf32>
    %122 = arith.mulf %120, %121 : vector<64x8xf32>
    %123 = vector.broadcast %118 : vector<64x1xf32> to vector<64x8xf32>
    %124 = arith.addf %122, %123 : vector<64x8xf32>
    %125 = vector.extract_strided_slice %116 {offsets = [0, 0], sizes = [1, 8], strides = [1, 1]} : vector<2x8xf32> to vector<1x8xf32>
    %126 = vector.broadcast %4 : vector<64x1xf32> to vector<64x8xf32>
    %127 = vector.broadcast %125 : vector<1x8xf32> to vector<64x8xf32>
    %128 = arith.mulf %126, %127 : vector<64x8xf32>
    %129 = arith.addf %124, %128 : vector<64x8xf32>
    %130 = math.tanh %129 : vector<64x8xf32>
    %cst_21 = arith.constant dense<0.000000e+00> : vector<2x8xf32>
    %131 = tpu.matmul %3, %130, %cst_21 {dimension_numbers = #tpu.dot_dimension_numbers<[1], [0], [0], [1], [0, 0, 1, 1], [], []>} : vector<2x64xf32>, vector<64x8xf32>, vector<2x8xf32> -> vector<2x8xf32>
    %132 = arith.addf %116, %131 : vector<2x8xf32>
    %c14 = arith.constant 14 : index
    %c0_22 = arith.constant 0 : index
    %133 = vector.load %arg5[%c14, %c0_22] : memref<18x8xf32, #tpu.memory_space<vmem>>, vector<2x8xf32>
    tpu.vector_store %arg5[%c14, %c0_22], %132 {strides = array<i32>} : memref<18x8xf32, #tpu.memory_space<vmem>>, vector<2x8xf32>,
    %134 = vector.extract_strided_slice %2 {offsets = [0, 8], sizes = [64, 1], strides = [1, 1]} : vector<64x9xf32> to vector<64x1xf32>
    %135 = vector.extract_strided_slice %132 {offsets = [1, 0], sizes = [1, 8], strides = [1, 1]} : vector<2x8xf32> to vector<1x8xf32>
    %136 = vector.broadcast %5 : vector<64x1xf32> to vector<64x8xf32>
    %137 = vector.broadcast %135 : vector<1x8xf32> to vector<64x8xf32>
    %138 = arith.mulf %136, %137 : vector<64x8xf32>
    %139 = vector.broadcast %134 : vector<64x1xf32> to vector<64x8xf32>
    %140 = arith.addf %138, %139 : vector<64x8xf32>
    %141 = vector.extract_strided_slice %132 {offsets = [0, 0], sizes = [1, 8], strides = [1, 1]} : vector<2x8xf32> to vector<1x8xf32>
    %142 = vector.broadcast %4 : vector<64x1xf32> to vector<64x8xf32>
    %143 = vector.broadcast %141 : vector<1x8xf32> to vector<64x8xf32>
    %144 = arith.mulf %142, %143 : vector<64x8xf32>
    %145 = arith.addf %140, %144 : vector<64x8xf32>
    %146 = math.tanh %145 : vector<64x8xf32>
    %cst_23 = arith.constant dense<0.000000e+00> : vector<2x8xf32>
    %147 = tpu.matmul %3, %146, %cst_23 {dimension_numbers = #tpu.dot_dimension_numbers<[1], [0], [0], [1], [0, 0, 1, 1], [], []>} : vector<2x64xf32>, vector<64x8xf32>, vector<2x8xf32> -> vector<2x8xf32>
    %148 = arith.addf %132, %147 : vector<2x8xf32>
    %c16 = arith.constant 16 : index
    %c0_24 = arith.constant 0 : index
    %149 = vector.load %arg5[%c16, %c0_24] : memref<18x8xf32, #tpu.memory_space<vmem>>, vector<2x8xf32>
    tpu.vector_store %arg5[%c16, %c0_24], %148 {strides = array<i32>} : memref<18x8xf32, #tpu.memory_space<vmem>>, vector<2x8xf32>,
    return
  }
  func.func @transform_0(%arg0: i32) -> (i32, i32) {
    %c0_i32 = arith.constant 0 : i32
    %c0_i32_0 = arith.constant 0 : i32
    return %c0_i32, %arg0 : i32, i32
  }
  func.func @transform_1(%arg0: i32) -> (i32, i32) {
    %c0_i32 = arith.constant 0 : i32
    %c0_i32_0 = arith.constant 0 : i32
    %c0_i32_1 = arith.constant 0 : i32
    return %c0_i32, %c0_i32_0 : i32, i32
  }
  func.func @transform_2(%arg0: i32) -> (i32, i32) {
    %c0_i32 = arith.constant 0 : i32
    %c0_i32_0 = arith.constant 0 : i32
    %c0_i32_1 = arith.constant 0 : i32
    return %c0_i32, %c0_i32_0 : i32, i32
  }
  func.func @transform_3(%arg0: i32) -> (i32, i32) {
    %c0_i32 = arith.constant 0 : i32
    %c0_i32_0 = arith.constant 0 : i32
    %c0_i32_1 = arith.constant 0 : i32
    return %c0_i32, %c0_i32_0 : i32, i32
  }
  func.func @transform_4(%arg0: i32) -> (i32, i32) {
    %c0_i32 = arith.constant 0 : i32
    %c0_i32_0 = arith.constant 0 : i32
    return %c0_i32, %arg0 : i32, i32
  }
}

</mosaic_0001>

<bundles_post_ra>
// kernel: tpu_custom_call.1
= control target key start
LH: loop header
LB: loop body
LE: loop exit
PB: predicated region body
PF: predicated region fallthrough
CT: control target
= control target key end

     0   :  { %v1942_v0 = vmov 0   ;;  %v1943_v1 = vmov 1   ;;  %v1944_v11 = vmov 0.0   ;;  %vm1945_vm0 = vmmov 0   ;;  %s2582_s2 = inlined_call_operand.vmem [shape: f32[64,9], index: 2, kind: input, shape index: {}]   ;;  %s2583_s1 = inlined_call_operand.vmem [shape: f32[64,2], index: 1, kind: input, shape index: {}]   ;;  %s2584_s0 = inlined_call_operand.vmem [shape: f32[2,8], index: 0, kind: input, shape index: {}]   ;;  %s2585_s3 = inlined_call_operand.vmem [shape: f32[2,64], index: 3, kind: input, shape index: {}]   ;;  %s2586_s4 = inlined_call_operand.vmem [shape: f32[18,8], index: 4, kind: output, shape index: {}]  }
   0x1   :  { %1765 = vset.pattern.permute.xlu1 %v1942_v0  ;;  %1764 = vset.pattern.permute.xlu0 %v1943_v1  ;;  %v1981_v2 = vld [vmem:[%s2582_s2 + $0x38] sm:$0xff]  ;;  %v24_v4 = vld [vmem:[%s2583_s1 + $0x30] sm:$0xff]  ;;  %v23_v6 = vld [vmem:[%s2583_s1 + $0x28] sm:$0xff]  ;;  %v75_v19 = vlaneseq  ;;  %vm195_vm1 = vcmask 523264   ;;  %vm270_vm2 = vcmask 58368  }
   0x2   :  { %v25_v3 = vld [vmem:[%s2583_s1 + $0x38] sm:$0xff]  ;;  %124 = vperm.xlu1 %1765, %v1981_v2   ;;  %v1993_v5 = vld [vmem:[%s2582_s2 + $0x30] sm:$0xff]  ;;  %v22_v8 = vld [vmem:[%s2583_s1 + $0x20] sm:$0xff]  ;;  %1582 = vmatprep.subr.mxu0 %v1944_v11 }
   0x3   :  { %72 = vperm.xlu0 %1764, %v25_v3   ;;  %v20_v7 = vld [vmem:[%s2583_s1 + $0x10] sm:$0xff]  ;;  %v19_v9 = vld [vmem:[%s2583_s1 + $0x8] sm:$0xff]  ;;  %1601 = vmatprep.subr.mxu1 %v1944_v11  ;;  %v21_v12 = vld [vmem:[%s2583_s1 + $0x18] sm:$0xff]  ;;  %v76_v20 = vshrl.u32 %v75_v19, 7 }
   0x4   :  { %v2011_v10 = vld [vmem:[%s2582_s2 + $0x28] sm:$0xff]  ;;  %v2022_v13 = vld [vmem:[%s2582_s2 + $0x20] sm:$0xff]  ;;  %v2028_v14 = vld [vmem:[%s2582_s2 + $0x18] sm:$0xff]  ;;  %1598 = vmatprep.mubr.msk.f32.mxu0 %vm1945_vm0, %v1944_v11  ;;  %1617 = vmatprep.mubr.msk.f32.mxu1 %vm1945_vm0, %v1944_v11 }
   0x5   :  { %v2034_v15 = vld [vmem:[%s2582_s2 + $0x10] sm:$0xff]  ;;  %v18_v16 = vld [vmem:[%s2583_s1] sm:$0xff]  ;;  %v2044_v17 = vld [vmem:[%s2582_s2 + $0x8] sm:$0xff]  ;;  %v2064_v21 = vsub.s32 1, %v76_v20  ;;  %v2071_v23 = vsub.s32 0, %v76_v20 }
   0x6   :  { %164 = vperm.xlu1 %1765, %v25_v3   ;;  %v2051_v18 = vld [vmem:[%s2582_s2] sm:$0xff] }
   0x7   :  { %67 = vperm.xlu0 %1764, %v24_v4   ;;  %v2069_v22 = vld [vmem:[%s2584_s0] sm:$0x3] }
   0x8   :  { %v2075_v24 = vrot.slane %v2069_v22, %v2064_v21  ;;  %v2081_v27 = vrot.slane %v2069_v22, %v2071_v23 }
   0xa   :  { %119 = vperm.xlu1 %1765, %v1993_v5  }
   0xb   :  { %62 = vperm.xlu0 %1764, %v23_v6  }
   0xe   :  { %1766 = vset.pattern.permute.xlu1 %v1943_v1 }
   0xf   :  { %47 = vperm.xlu0 %1764, %v20_v7   ;;  %57 = vperm.xlu1 %1766, %v22_v8  }
  0x13   :  { %42 = vperm.xlu0 %1764, %v19_v9   ;;  %1767 = vset.pattern.permute.xlu1 %v1942_v0 }
  0x14   :  { %114 = vperm.xlu1 %1767, %v2011_v10  }
  0x17   :  { %1770 = vset.pattern.permute.xlu0 %v1942_v0 }
  0x18   :  { %160 = vperm.xlu0 %1770, %v24_v4   ;;  %1768 = vset.pattern.permute.xlu1 %v1943_v1 }
  0x19   :  { %52 = vperm.xlu1 %1768, %v21_v12  }
  0x1c   :  { %156 = vperm.xlu0 %1770, %v23_v6  }
  0x1d   :  { %1769 = vset.pattern.permute.xlu1 %v1942_v0 }
  0x1e   :  { %152 = vperm.xlu1 %1769, %v22_v8  }
  0x20   :  { %109 = vperm.xlu0 %1770, %v2022_v13  }
  0x22   :  { %104 = vperm.xlu1 %1769, %v2028_v14  }
  0x24   :  { %144 = vperm.xlu0 %1770, %v20_v7  }
  0x26   :  { %148 = vperm.xlu1 %1769, %v21_v12  }
  0x28   :  { %140 = vperm.xlu0 %1770, %v19_v9  }
  0x2a   :  { %99 = vperm.xlu1 %1769, %v2034_v15  }
  0x2c   :  { %136 = vperm.xlu0 %1770, %v18_v16  }
  0x2e   :  { %1771 = vset.pattern.permute.xlu1 %v1943_v1 }
  0x2f   :  { %37 = vperm.xlu1 %1771, %v18_v16  }
  0x30   :  { %1774 = vset.pattern.permute.xlu0 %v1943_v1 }
  0x31   :  { %309 = vperm.xlu0 %1774, %v1993_v5  }
  0x33   :  { %1772 = vset.pattern.permute.xlu1 %v1942_v0 }
  0x34   :  { %94 = vperm.xlu1 %1772, %v2044_v17  }
  0x35   :  { %297 = vperm.xlu0 %1774, %v2028_v14  }
  0x38   :  { %89 = vperm.xlu1 %1772, %v2051_v18  }
  0x39   :  { %289 = vperm.xlu0 %1774, %v2044_v17  }
  0x3c   :  { %1773 = vset.pattern.permute.xlu1 %v1943_v1 }
  0x3d   :  { %313 = vperm.xlu1 %1773, %v1981_v2  }
  0x41   :  { %305 = vperm.xlu1 %1773, %v2011_v10  }
  0x45   :  { %301 = vperm.xlu1 %1773, %v2022_v13  }
  0x49   :  { %293 = vperm.xlu1 %1773, %v2034_v15  }
  0x4d   :  { %285 = vperm.xlu1 %1773, %v2051_v18  }
  0x7d   :  { %v125_v25 = vpop.permute.xlu1 %124 }
  0x7e   :  { %v2077_v26 = vpop.permute.xlu0 %72 }
  0x7f   :  { %v86_v28 = vmul.f32 %v2075_v24, %v2077_v26 }
  0x81   :  { %v2085_v29 = vpop.permute.xlu1 %164  ;;  %v134_v31 = vadd.f32 %v125_v25, %v86_v28 }
  0x82   :  { %v2087_v30 = vpop.permute.xlu0 %67  ;;  %v178_v32 = vmul.f32 %v2081_v27, %v2085_v29 }
  0x83   :  { %v85_v39 = vmul.f32 %v2075_v24, %v2087_v30 }
  0x84   :  { %v186_v33 = vadd.f32 %v178_v32, %v134_v31 }
  0x85   :  { %v120_v34 = vpop.permute.xlu1 %119 }
  0x86   :  { %v2091_v35 = vpop.permute.xlu0 %62  ;;  %1789 = vtanh.f32 %v186_v33  ;;  %v133_v43 = vadd.f32 %v120_v34, %v85_v39 }
  0x87   :  { %v84_v46 = vmul.f32 %v2075_v24, %v2091_v35 }
  0x8a   :  { %v2093_v36 = vpop.permute.xlu0 %47  ;;  %v2095_v37 = vpop.permute.xlu1 %57 }
  0x8b   :  { %v83_v53 = vmul.f32 %v2075_v24, %v2095_v37  ;;  %v81_v3 = vmul.f32 %v2075_v24, %v2093_v36 }
  0x8e   :  { %v2097_v38 = vpop.permute.xlu0 %42 }
  0x8f   :  { %v115_v40 = vpop.permute.xlu1 %114  ;;  %v80_v20 = vmul.f32 %v2075_v24, %v2097_v38 }
  0x90   :  { %v132_v49 = vadd.f32 %v115_v40, %v84_v46 }
  0x93   :  { %v2101_v41 = vpop.permute.xlu0 %160  ;;  %v1790_v42 = vpop.eup %1789 }
  0x94   :  { %v177_v44 = vmul.f32 %v2081_v27, %v2101_v41  ;;  %v2105_v45 = vpop.permute.xlu1 %52  ;;  %1583 = vmatpush3.msra.mxu0 %v1790_v42 }
  0x95   :  { %1584 = vmatprep.subr.mxu0 %v1944_v11  ;;  %v82_v59 = vmul.f32 %v2075_v24, %v2105_v45 }
  0x96   :  { %v185_v47 = vadd.f32 %v177_v44, %v133_v43 }
  0x97   :  { %v2110_v48 = vpop.permute.xlu0 %156 }
  0x98   :  { %1791 = vtanh.f32 %v185_v47  ;;  %v176_v50 = vmul.f32 %v2081_v27, %v2110_v48 }
  0x99   :  { %v2114_v52 = vpop.permute.xlu1 %152 }
  0x9a   :  { %v184_v51 = vadd.f32 %v176_v50, %v132_v49  ;;  %v175_v55 = vmul.f32 %v2081_v27, %v2114_v52  ;;  %v1946_v49 = vmov 2  }
  0x9b   :  { %v110_v54 = vpop.permute.xlu0 %109  ;;  %1775 = vset.pattern.permute.xlu0 %v1946_v49  ;;  %1776 = vset.pattern.permute.xlu1 %v1946_v49 }
  0x9c   :  { %1793 = vtanh.f32 %v184_v51  ;;  %v131_v56 = vadd.f32 %v110_v54, %v83_v53  ;;  %465 = vperm.xlu0 %1775, %v1981_v2   ;;  %461 = vperm.xlu1 %1776, %v1993_v5  }
  0x9d   :  { %v105_v58 = vpop.permute.xlu1 %104 }
  0x9e   :  { %v183_v57 = vadd.f32 %v175_v55, %v131_v56  ;;  %v130_v61 = vadd.f32 %v105_v58, %v82_v59 }
  0x9f   :  { %v2126_v63 = vpop.permute.xlu0 %144 }
  0xa0   :  { %1795 = vtanh.f32 %v183_v57  ;;  %v173_v7 = vmul.f32 %v2081_v27, %v2126_v63  ;;  %453 = vperm.xlu0 %1775, %v2022_v13   ;;  %457 = vperm.xlu1 %1776, %v2011_v10  }
  0xa1   :  { %v2122_v60 = vpop.permute.xlu1 %148 }
  0xa2   :  { %v174_v62 = vmul.f32 %v2081_v27, %v2122_v60 }
  0xa3   :  { %v2136_v16 = vpop.permute.xlu0 %140 }
  0xa4   :  { %v182_v1 = vadd.f32 %v174_v62, %v130_v61  ;;  %v172_v31 = vmul.f32 %v2081_v27, %v2136_v16  ;;  %445 = vperm.xlu0 %1775, %v2034_v15   ;;  %449 = vperm.xlu1 %1776, %v2028_v14  }
  0xa5   :  { %v1792_v0 = vpop.eup %1791  ;;  %v100_v4 = vpop.permute.xlu1 %99 }
  0xa6   :  { %1585 = vmatpush3.msra.mxu0 %v1792_v0  ;;  %1797 = vtanh.f32 %v182_v1  ;;  %v129_v6 = vadd.f32 %v100_v4, %v81_v3 }
  0xa7   :  { %1586 = vmatprep.subr.mxu0 %v1944_v11  ;;  %v2143_v32 = vpop.permute.xlu0 %136 }
  0xa8   :  { %v181_v9 = vadd.f32 %v173_v7, %v129_v6  ;;  %v171_v43 = vmul.f32 %v2081_v27, %v2143_v32  ;;  %437 = vperm.xlu0 %1775, %v2051_v18   ;;  %441 = vperm.xlu1 %1776, %v2044_v17  }
  0xa9   :  { %v1794_v8 = vpop.eup %1793 }
  0xaa   :  { %1587 = vmatpush3.msra.mxu0 %v1794_v8  ;;  %1799 = vtanh.f32 %v181_v9  ;;  %v2133_v12 = vpop.permute.xlu1 %37 }
  0xab   :  { %1588 = vmatprep.subr.mxu0 %v1944_v11  ;;  %v79_v34 = vmul.f32 %v2075_v24, %v2133_v12  ;;  %v2155_v24 = vld [vmem:[%s2585_s3] sm:$0x3] }
  0xac   :  { %v310_v56 = vpop.permute.xlu0 %309 }
  0xad   :  { %v1796_v19 = vpop.eup %1795 }
  0xae   :  { %1589 = vmatpush3.msra.mxu0 %v1796_v19 }
  0xaf   :  { %1590 = vmatprep.subr.mxu0 %v1944_v11  ;;  %v95_v25 = vpop.permute.xlu1 %94 }
  0xb0   :  { %v128_v28 = vadd.f32 %v95_v25, %v80_v20  ;;  %v298_v3 = vpop.permute.xlu0 %297 }
  0xb2   :  { %v180_v33 = vadd.f32 %v172_v31, %v128_v28 }
  0xb3   :  { %v1798_v39 = vpop.eup %1797  ;;  %v90_v40 = vpop.permute.xlu1 %89 }
  0xb4   :  { %1801 = vtanh.f32 %v180_v33  ;;  %v127_v42 = vadd.f32 %v90_v40, %v79_v34  ;;  %1591 = vmatpush3.msra.mxu0 %v1798_v39 }
  0xb5   :  { %1592 = vmatprep.subr.mxu0 %v1944_v11 }
  0xb6   :  { %v179_v44 = vadd.f32 %v171_v43, %v127_v42 }
  0xb7   :  { %v1800_v46 = vpop.eup %1799 }
  0xb8   :  { %1803 = vtanh.f32 %v179_v44  ;;  %1593 = vmatpush3.msra.mxu0 %v1800_v46  ;;  %v314_v50 = vpop.permute.xlu1 %313  ;;  %v290_v44 = vpop.permute.xlu0 %289 }
  0xb9   :  { %1594 = vmatprep.subr.mxu0 %v1944_v11 }
  0xbc   :  { %v306_v53 = vpop.permute.xlu1 %305 }
  0xc0   :  { %v302_v61 = vpop.permute.xlu1 %301 }
  0xc1   :  { %v1802_v47 = vpop.eup %1801 }
  0xc2   :  { %1595 = vmatpush3.msra.mxu0 %v1802_v47 }
  0xc3   :  { %1596 = vmatprep.subr.mxu0 %v1944_v11 }
  0xc4   :  { %v294_v33 = vpop.permute.xlu1 %293 }
  0xc5   :  { %v1804_v27 = vpop.eup %1803 }
  0xc6   :  { %1597 = vmatpush3.msra.mxu0 %v1804_v27 }
  0xc7   :  { %1599 = vmatmul.mubr.msk.f32.vlgmr.msra.gmra.mxu0 %vm195_vm1, %v2155_v24  ;;  %1620 = vmatprep.subr.mxu0 %v1944_v11 }
  0xc8   :  { %1636 = vmatprep.mubr.msk.f32.mxu0 %vm1945_vm0, %v1944_v11 }
 0x187   :  { %v265_v51 = vpop.f32.mrf.mxu0 }
 0x188   :  { %v2171_v54 = vadd.f32 %v265_v51, %v2069_v22 }
 0x189   :  { %v1600_v55 = vpop.f32.mrf.mxu0 }
 0x18a   :  { %271 = vst.msk [vmem:[%s2586_s4] sm:$0x3] %vm270_vm2, %v2171_v54  ;;  %v275_v57 = vrot.slane %v2171_v54, %v2064_v21  ;;  %v327_v58 = vrot.slane %v2171_v54, %v2071_v23 }
 0x18c   :  { %v283_v59 = vmul.f32 %v275_v57, %v2077_v26  ;;  %v282_v22 = vmul.f32 %v275_v57, %v2087_v30  ;;  %v335_v0 = vmul.f32 %v327_v58, %v2085_v29  ;;  %v281_v1 = vmul.f32 %v275_v57, %v2091_v35 }
 0x18d   :  { %v280_v6 = vmul.f32 %v275_v57, %v2095_v37  ;;  %v279_v7 = vmul.f32 %v275_v57, %v2105_v45  ;;  %v334_v9 = vmul.f32 %v327_v58, %v2101_v41  ;;  %v333_v25 = vmul.f32 %v327_v58, %v2110_v48 }
 0x18e   :  { %v323_v62 = vadd.f32 %v314_v50, %v283_v59  ;;  %v322_v4 = vadd.f32 %v310_v56, %v282_v22  ;;  %v321_v19 = vadd.f32 %v306_v53, %v281_v1  ;;  %v278_v31 = vmul.f32 %v275_v57, %v2093_v36  ;;  %v286_v53 = vpop.permute.xlu1 %285 }
 0x18f   :  { %v320_v28 = vadd.f32 %v302_v61, %v280_v6  ;;  %v277_v34 = vmul.f32 %v275_v57, %v2097_v38  ;;  %v319_v39 = vadd.f32 %v298_v3, %v279_v7  ;;  %v332_v42 = vmul.f32 %v327_v58, %v2114_v52 }
 0x190   :  { %v343_v8 = vadd.f32 %v335_v0, %v323_v62  ;;  %v342_v20 = vadd.f32 %v334_v9, %v322_v4  ;;  %v341_v40 = vadd.f32 %v333_v25, %v321_v19  ;;  %v331_v43 = vmul.f32 %v327_v58, %v2122_v60  ;;  %v466_v19 = vpop.permute.xlu0 %465 }
 0x191   :  { %v276_v46 = vmul.f32 %v275_v57, %v2133_v12  ;;  %v340_v47 = vadd.f32 %v332_v42, %v320_v28  ;;  %v318_v27 = vadd.f32 %v294_v33, %v278_v31  ;;  %v317_v50 = vadd.f32 %v290_v44, %v277_v34 }
 0x192   :  { %1805 = vtanh.f32 %v343_v8  ;;  %v339_v49 = vadd.f32 %v331_v43, %v319_v39  ;;  %v330_v51 = vmul.f32 %v327_v58, %v2126_v63  ;;  %v329_v56 = vmul.f32 %v327_v58, %v2136_v16  ;;  %v462_v9 = vpop.permute.xlu1 %461 }
 0x193   :  { %1807 = vtanh.f32 %v342_v20  ;;  %v316_v55 = vadd.f32 %v286_v53, %v276_v46  ;;  %v328_v61 = vmul.f32 %v327_v58, %v2143_v32  ;;  %v1947_v8 = vmov 3  }
 0x194   :  { %1809 = vtanh.f32 %v341_v40  ;;  %v338_v59 = vadd.f32 %v330_v51, %v318_v27  ;;  %v337_v22 = vadd.f32 %v329_v56, %v317_v50  ;;  %1777 = vset.pattern.permute.xlu1 %v1947_v8  ;;  %1778 = vset.pattern.permute.xlu0 %v1947_v8  ;;  %v454_v39 = vpop.permute.xlu0 %453 }
 0x195   :  { %1811 = vtanh.f32 %v340_v47  ;;  %v336_v62 = vadd.f32 %v328_v61, %v316_v55  ;;  %617 = vperm.xlu1 %1777, %v1981_v2   ;;  %613 = vperm.xlu0 %1778, %v1993_v5  }
 0x196   :  { %1813 = vtanh.f32 %v339_v49  ;;  %v458_v31 = vpop.permute.xlu1 %457 }
 0x197   :  { %1815 = vtanh.f32 %v338_v59 }
 0x198   :  { %1817 = vtanh.f32 %v337_v22  ;;  %v446_v55 = vpop.permute.xlu0 %445 }
 0x199   :  { %1819 = vtanh.f32 %v336_v62  ;;  %609 = vperm.xlu1 %1777, %v2011_v10   ;;  %601 = vperm.xlu0 %1778, %v2028_v14  }
 0x19a   :  { %v450_v27 = vpop.permute.xlu1 %449 }
 0x19c   :  { %v438_v8 = vpop.permute.xlu0 %437 }
 0x19d   :  { %605 = vperm.xlu1 %1777, %v2022_v13   ;;  %593 = vperm.xlu0 %1778, %v2044_v17  }
 0x19f   :  { %v1806_v57 = vpop.eup %1805 }
 0x1a0   :  { %1602 = vmatpush3.msra.mxu1 %v1806_v57  ;;  %v1808_v0 = vpop.eup %1807 }
 0x1a1   :  { %1603 = vmatprep.subr.mxu1 %v1944_v11  ;;  %v1810_v1 = vpop.eup %1809  ;;  %597 = vperm.xlu1 %1777, %v2034_v15  }
 0x1a2   :  { %1604 = vmatpush3.msra.mxu1 %v1808_v0  ;;  %v1812_v3 = vpop.eup %1811 }
 0x1a3   :  { %1605 = vmatprep.subr.mxu1 %v1944_v11  ;;  %v1814_v58 = vpop.eup %1813 }
 0x1a4   :  { %1606 = vmatpush3.msra.mxu1 %v1810_v1  ;;  %v1816_v4 = vpop.eup %1815 }
 0x1a5   :  { %1607 = vmatprep.subr.mxu1 %v1944_v11  ;;  %v1818_v6 = vpop.eup %1817  ;;  %589 = vperm.xlu1 %1777, %v2051_v18  }
 0x1a6   :  { %1608 = vmatpush3.msra.mxu1 %v1812_v3  ;;  %v1820_v7 = vpop.eup %1819 }
 0x1a7   :  { %1609 = vmatprep.subr.mxu1 %v1944_v11 }
 0x1a8   :  { %1610 = vmatpush3.msra.mxu1 %v1814_v58  ;;  %v442_v58 = vpop.permute.xlu1 %441 }
 0x1a9   :  { %1611 = vmatprep.subr.mxu1 %v1944_v11 }
 0x1aa   :  { %1612 = vmatpush3.msra.mxu1 %v1816_v4 }
 0x1ab   :  { %1613 = vmatprep.subr.mxu1 %v1944_v11 }
 0x1ac   :  { %1614 = vmatpush3.msra.mxu1 %v1818_v6 }
 0x1ad   :  { %1615 = vmatprep.subr.mxu1 %v1944_v11 }
 0x1ae   :  { %1616 = vmatpush3.msra.mxu1 %v1820_v7 }
 0x1af   :  { %1618 = vmatmul.mubr.msk.f32.vlgmr.msra.gmra.mxu1 %vm195_vm1, %v2155_v24  ;;  %1639 = vmatprep.subr.mxu1 %v1944_v11 }
 0x1b0   :  { %1655 = vmatprep.mubr.msk.f32.mxu1 %vm1945_vm0, %v1944_v11 }
 0x26f   :  { %v418_v20 = vpop.f32.mrf.mxu1 }
 0x270   :  { %v2219_v25 = vadd.f32 %v418_v20, %v2171_v54 }
 0x271   :  { %v1619_v28 = vpop.f32.mrf.mxu1 }
 0x272   :  { %423 = vst.msk [vmem:[%s2586_s4 + $0x2] sm:$0x3] %vm270_vm2, %v2219_v25  ;;  %v427_v33 = vrot.slane %v2219_v25, %v2064_v21  ;;  %v479_v34 = vrot.slane %v2219_v25, %v2071_v23 }
 0x274   :  { %v434_v40 = vmul.f32 %v427_v33, %v2087_v30  ;;  %v435_v54 = vmul.f32 %v427_v33, %v2077_v26  ;;  %v433_v42 = vmul.f32 %v427_v33, %v2091_v35  ;;  %v432_v44 = vmul.f32 %v427_v33, %v2095_v37 }
 0x275   :  { %v487_v47 = vmul.f32 %v479_v34, %v2085_v29  ;;  %v486_v50 = vmul.f32 %v479_v34, %v2101_v41  ;;  %v431_v53 = vmul.f32 %v427_v33, %v2105_v45  ;;  %v485_v59 = vmul.f32 %v479_v34, %v2110_v48 }
 0x276   :  { %v475_v43 = vadd.f32 %v466_v19, %v435_v54  ;;  %v474_v46 = vadd.f32 %v462_v9, %v434_v40  ;;  %v473_v49 = vadd.f32 %v458_v31, %v433_v42  ;;  %v472_v56 = vadd.f32 %v454_v39, %v432_v44 }
 0x277   :  { %v430_v22 = vmul.f32 %v427_v33, %v2093_v36  ;;  %v484_v62 = vmul.f32 %v479_v34, %v2114_v52  ;;  %v471_v0 = vadd.f32 %v450_v27, %v431_v53  ;;  %v429_v1 = vmul.f32 %v427_v33, %v2097_v38 }
 0x278   :  { %v495_v51 = vadd.f32 %v487_v47, %v475_v43  ;;  %v494_v61 = vadd.f32 %v486_v50, %v474_v46  ;;  %v493_v57 = vadd.f32 %v485_v59, %v473_v49  ;;  %v483_v3 = vmul.f32 %v479_v34, %v2122_v60 }
 0x279   :  { %v492_v4 = vadd.f32 %v484_v62, %v472_v56  ;;  %v470_v6 = vadd.f32 %v446_v55, %v430_v22  ;;  %v428_v7 = vmul.f32 %v427_v33, %v2133_v12  ;;  %v482_v9 = vmul.f32 %v479_v34, %v2126_v63  ;;  %v614_v22 = vpop.permute.xlu0 %613 }
 0x27a   :  { %1821 = vtanh.f32 %v495_v51  ;;  %v491_v19 = vadd.f32 %v483_v3, %v471_v0  ;;  %v469_v20 = vadd.f32 %v442_v58, %v429_v1  ;;  %v481_v39 = vmul.f32 %v479_v34, %v2136_v16  ;;  %v618_v51 = vpop.permute.xlu1 %617 }
 0x27b   :  { %1823 = vtanh.f32 %v494_v61  ;;  %v490_v28 = vadd.f32 %v482_v9, %v470_v6  ;;  %v468_v31 = vadd.f32 %v438_v8, %v428_v7  ;;  %v480_v40 = vmul.f32 %v479_v34, %v2143_v32 }
 0x27c   :  { %1825 = vtanh.f32 %v493_v57  ;;  %v489_v54 = vadd.f32 %v481_v39, %v469_v20  ;;  %v1948_v50 = vmov 4  }
 0x27d   :  { %1827 = vtanh.f32 %v492_v4  ;;  %v488_v42 = vadd.f32 %v480_v40, %v468_v31  ;;  %1779 = vset.pattern.permute.xlu0 %v1948_v50  ;;  %1780 = vset.pattern.permute.xlu1 %v1948_v50  ;;  %v602_v7 = vpop.permute.xlu0 %601 }
 0x27e   :  { %1829 = vtanh.f32 %v491_v19  ;;  %769 = vperm.xlu0 %1779, %v1981_v2   ;;  %765 = vperm.xlu1 %1780, %v1993_v5   ;;  %v610_v56 = vpop.permute.xlu1 %609 }
 0x27f   :  { %1831 = vtanh.f32 %v490_v28 }
 0x280   :  { %1833 = vtanh.f32 %v489_v54 }
 0x281   :  { %1835 = vtanh.f32 %v488_v42 }
 0x282   :  { %757 = vperm.xlu0 %1779, %v2022_v13   ;;  %761 = vperm.xlu1 %1780, %v2011_v10   ;;  %v606_v1 = vpop.permute.xlu1 %605 }
 0x286   :  { %749 = vperm.xlu0 %1779, %v2034_v15   ;;  %753 = vperm.xlu1 %1780, %v2028_v14   ;;  %v598_v54 = vpop.permute.xlu1 %597 }
 0x287   :  { %v1822_v43 = vpop.eup %1821 }
 0x288   :  { %1621 = vmatpush3.msra.mxu0 %v1822_v43  ;;  %v1824_v33 = vpop.eup %1823 }
 0x289   :  { %1622 = vmatprep.subr.mxu0 %v1944_v11  ;;  %v1826_v44 = vpop.eup %1825 }
 0x28a   :  { %1623 = vmatpush3.msra.mxu0 %v1824_v33  ;;  %v1828_v46 = vpop.eup %1827  ;;  %741 = vperm.xlu0 %1779, %v2051_v18  }
 0x28b   :  { %1624 = vmatprep.subr.mxu0 %v1944_v11  ;;  %v1830_v34 = vpop.eup %1829  ;;  %745 = vperm.xlu1 %1780, %v2044_v17  }
 0x28c   :  { %1625 = vmatpush3.msra.mxu0 %v1826_v44  ;;  %v1832_v47 = vpop.eup %1831 }
 0x28d   :  { %1626 = vmatprep.subr.mxu0 %v1944_v11  ;;  %v1834_v27 = vpop.eup %1833 }
 0x28e   :  { %1627 = vmatpush3.msra.mxu0 %v1828_v46  ;;  %v1836_v49 = vpop.eup %1835 }
 0x28f   :  { %1628 = vmatprep.subr.mxu0 %v1944_v11 }
 0x290   :  { %1629 = vmatpush3.msra.mxu0 %v1830_v34  ;;  %v594_v34 = vpop.permute.xlu0 %593 }
 0x291   :  { %1630 = vmatprep.subr.mxu0 %v1944_v11 }
 0x292   :  { %1631 = vmatpush3.msra.mxu0 %v1832_v47 }
 0x293   :  { %1632 = vmatprep.subr.mxu0 %v1944_v11 }
 0x294   :  { %1633 = vmatpush3.msra.mxu0 %v1834_v27 }
 0x295   :  { %1634 = vmatprep.subr.mxu0 %v1944_v11 }
 0x296   :  { %1635 = vmatpush3.msra.mxu0 %v1836_v49 }
 0x297   :  { %1637 = vmatmul.mubr.msk.f32.vlgmr.msra.gmra.mxu0 %vm195_vm1, %v2155_v24  ;;  %1658 = vmatprep.subr.mxu0 %v1944_v11 }
 0x298   :  { %1674 = vmatprep.mubr.msk.f32.mxu0 %vm1945_vm0, %v1944_v11 }
 0x357   :  { %v570_v53 = vpop.f32.mrf.mxu0 }
 0x358   :  { %v2267_v55 = vadd.f32 %v570_v53, %v2219_v25 }
 0x359   :  { %v1638_v59 = vpop.f32.mrf.mxu0 }
 0x35a   :  { %575 = vst.msk [vmem:[%s2586_s4 + $0x4] sm:$0x3] %vm270_vm2, %v2267_v55  ;;  %v579_v61 = vrot.slane %v2267_v55, %v2064_v21  ;;  %v631_v57 = vrot.slane %v2267_v55, %v2071_v23 }
 0x35c   :  { %v586_v62 = vmul.f32 %v579_v61, %v2087_v30  ;;  %v587_v25 = vmul.f32 %v579_v61, %v2077_v26  ;;  %v585_v0 = vmul.f32 %v579_v61, %v2091_v35  ;;  %v584_v58 = vmul.f32 %v579_v61, %v2095_v37 }
 0x35d   :  { %v639_v6 = vmul.f32 %v631_v57, %v2085_v29  ;;  %v638_v9 = vmul.f32 %v631_v57, %v2101_v41  ;;  %v583_v20 = vmul.f32 %v579_v61, %v2105_v45  ;;  %v582_v28 = vmul.f32 %v579_v61, %v2093_v36 }
 0x35e   :  { %v627_v3 = vadd.f32 %v618_v51, %v587_v25  ;;  %v626_v4 = vadd.f32 %v614_v22, %v586_v62  ;;  %v625_v8 = vadd.f32 %v610_v56, %v585_v0  ;;  %v624_v31 = vadd.f32 %v606_v1, %v584_v58  ;;  %v590_v56 = vpop.permute.xlu1 %589 }
 0x35f   :  { %v637_v39 = vmul.f32 %v631_v57, %v2110_v48  ;;  %v636_v42 = vmul.f32 %v631_v57, %v2114_v52  ;;  %v623_v33 = vadd.f32 %v602_v7, %v583_v20  ;;  %v581_v44 = vmul.f32 %v579_v61, %v2097_v38  ;;  %v770_v20 = vpop.permute.xlu0 %769 }
 0x360   :  { %v647_v19 = vadd.f32 %v639_v6, %v627_v3  ;;  %v646_v40 = vadd.f32 %v638_v9, %v626_v4  ;;  %v622_v46 = vadd.f32 %v598_v54, %v582_v28  ;;  %v635_v27 = vmul.f32 %v631_v57, %v2122_v60 }
 0x361   :  { %v645_v43 = vadd.f32 %v637_v39, %v625_v8  ;;  %v644_v47 = vadd.f32 %v636_v42, %v624_v31  ;;  %v580_v49 = vmul.f32 %v579_v61, %v2133_v12  ;;  %v634_v50 = vmul.f32 %v631_v57, %v2126_v63 }
 0x362   :  { %1837 = vtanh.f32 %v647_v19  ;;  %v643_v51 = vadd.f32 %v635_v27, %v623_v33  ;;  %v621_v53 = vadd.f32 %v594_v34, %v581_v44  ;;  %v633_v62 = vmul.f32 %v631_v57, %v2136_v16  ;;  %v766_v19 = vpop.permute.xlu1 %765 }
 0x363   :  { %1839 = vtanh.f32 %v646_v40  ;;  %v642_v59 = vadd.f32 %v634_v50, %v622_v46  ;;  %v620_v22 = vadd.f32 %v590_v56, %v580_v49  ;;  %v632_v25 = vmul.f32 %v631_v57, %v2143_v32  ;;  %v758_v40 = vpop.permute.xlu0 %757 }
 0x364   :  { %1841 = vtanh.f32 %v645_v43  ;;  %v641_v0 = vadd.f32 %v633_v62, %v621_v53  ;;  %v1949_v9 = vmov 5  }
 0x365   :  { %1843 = vtanh.f32 %v644_v47  ;;  %v640_v1 = vadd.f32 %v632_v25, %v620_v22  ;;  %1781 = vset.pattern.permute.xlu1 %v1949_v9  ;;  %1782 = vset.pattern.permute.xlu0 %v1949_v9 }
 0x366   :  { %1845 = vtanh.f32 %v643_v51  ;;  %921 = vperm.xlu1 %1781, %v1981_v2   ;;  %917 = vperm.xlu0 %1782, %v1993_v5   ;;  %v762_v5 = vpop.permute.xlu1 %761 }
 0x367   :  { %1847 = vtanh.f32 %v642_v59  ;;  %v750_v51 = vpop.permute.xlu0 %749 }
 0x368   :  { %1849 = vtanh.f32 %v641_v0 }
 0x369   :  { %1851 = vtanh.f32 %v640_v1 }
 0x36a   :  { %913 = vperm.xlu1 %1781, %v2011_v10   ;;  %905 = vperm.xlu0 %1782, %v2028_v14   ;;  %v754_v34 = vpop.permute.xlu1 %753 }
 0x36e   :  { %909 = vperm.xlu1 %1781, %v2022_v13   ;;  %897 = vperm.xlu0 %1782, %v2044_v17  }
 0x36f   :  { %v1838_v3 = vpop.eup %1837 }
 0x370   :  { %1640 = vmatpush3.msra.mxu1 %v1838_v3  ;;  %v1840_v61 = vpop.eup %1839 }
 0x371   :  { %1641 = vmatprep.subr.mxu1 %v1944_v11  ;;  %v1842_v58 = vpop.eup %1841 }
 0x372   :  { %1642 = vmatpush3.msra.mxu1 %v1840_v61  ;;  %v1844_v4 = vpop.eup %1843  ;;  %901 = vperm.xlu1 %1781, %v2034_v15   ;;  %v746_v61 = vpop.permute.xlu1 %745 }
 0x373   :  { %1643 = vmatprep.subr.mxu1 %v1944_v11  ;;  %v1846_v57 = vpop.eup %1845 }
 0x374   :  { %1644 = vmatpush3.msra.mxu1 %v1842_v58  ;;  %v1848_v6 = vpop.eup %1847 }
 0x375   :  { %1645 = vmatprep.subr.mxu1 %v1944_v11  ;;  %v1850_v7 = vpop.eup %1849 }
 0x376   :  { %1646 = vmatpush3.msra.mxu1 %v1844_v4  ;;  %v1852_v8 = vpop.eup %1851  ;;  %893 = vperm.xlu1 %1781, %v2051_v18  }
 0x377   :  { %1647 = vmatprep.subr.mxu1 %v1944_v11 }
 0x378   :  { %1648 = vmatpush3.msra.mxu1 %v1846_v57 }
 0x379   :  { %1649 = vmatprep.subr.mxu1 %v1944_v11 }
 0x37a   :  { %1650 = vmatpush3.msra.mxu1 %v1848_v6  ;;  %v742_v6 = vpop.permute.xlu0 %741 }
 0x37b   :  { %1651 = vmatprep.subr.mxu1 %v1944_v11 }
 0x37c   :  { %1652 = vmatpush3.msra.mxu1 %v1850_v7 }
 0x37d   :  { %1653 = vmatprep.subr.mxu1 %v1944_v11 }
 0x37e   :  { %1654 = vmatpush3.msra.mxu1 %v1852_v8 }
 0x37f   :  { %1656 = vmatmul.mubr.msk.f32.vlgmr.msra.gmra.mxu1 %vm195_vm1, %v2155_v24  ;;  %1677 = vmatprep.subr.mxu1 %v1944_v11 }
 0x380   :  { %1693 = vmatprep.mubr.msk.f32.mxu1 %vm1945_vm0, %v1944_v11 }
 0x43f   :  { %v722_v28 = vpop.f32.mrf.mxu1 }
 0x440   :  { %v2315_v31 = vadd.f32 %v722_v28, %v2267_v55 }
 0x441   :  { %v1657_v2 = vpop.f32.mrf.mxu1 }
 0x442   :  { %727 = vst.msk [vmem:[%s2586_s4 + $0x6] sm:$0x3] %vm270_vm2, %v2315_v31  ;;  %v731_v10 = vrot.slane %v2315_v31, %v2064_v21  ;;  %v783_v39 = vrot.slane %v2315_v31, %v2071_v23 }
 0x444   :  { %v738_v54 = vmul.f32 %v731_v10, %v2087_v30  ;;  %v739_v55 = vmul.f32 %v731_v10, %v2077_v26  ;;  %v737_v42 = vmul.f32 %v731_v10, %v2091_v35  ;;  %v736_v33 = vmul.f32 %v731_v10, %v2095_v37 }
 0x445   :  { %v791_v46 = vmul.f32 %v783_v39, %v2085_v29  ;;  %v790_v27 = vmul.f32 %v783_v39, %v2101_v41  ;;  %v735_v50 = vmul.f32 %v731_v10, %v2105_v45  ;;  %v789_v56 = vmul.f32 %v783_v39, %v2110_v48 }
 0x446   :  { %v779_v43 = vadd.f32 %v770_v20, %v739_v55  ;;  %v778_v44 = vadd.f32 %v766_v19, %v738_v54  ;;  %v777_v47 = vadd.f32 %v762_v5, %v737_v42  ;;  %v776_v53 = vadd.f32 %v758_v40, %v736_v33 }
 0x447   :  { %v734_v22 = vmul.f32 %v731_v10, %v2093_v36  ;;  %v788_v62 = vmul.f32 %v783_v39, %v2114_v52  ;;  %v775_v0 = vadd.f32 %v754_v34, %v735_v50  ;;  %v733_v1 = vmul.f32 %v731_v10, %v2097_v38  ;;  %v2357_v34 = vld [vmem:[%s2582_s2 + $0x38] sm:$0xff] }
 0x448   :  { %v799_v49 = vadd.f32 %v791_v46, %v779_v43  ;;  %v798_v59 = vadd.f32 %v790_v27, %v778_v44  ;;  %v797_v25 = vadd.f32 %v789_v56, %v777_v47  ;;  %v787_v3 = vmul.f32 %v783_v39, %v2122_v60  ;;  %v2363_v47 = vld [vmem:[%s2582_s2 + $0x30] sm:$0xff]  ;;  %v2370_v27 = vld [vmem:[%s2582_s2 + $0x28] sm:$0xff] }
 0x449   :  { %v796_v58 = vadd.f32 %v788_v62, %v776_v53  ;;  %v774_v4 = vadd.f32 %v750_v51, %v734_v22  ;;  %v732_v57 = vmul.f32 %v731_v10, %v2133_v12  ;;  %v786_v7 = vmul.f32 %v783_v39, %v2126_v63 }
 0x44a   :  { %1853 = vtanh.f32 %v799_v49  ;;  %v795_v8 = vadd.f32 %v787_v3, %v775_v0  ;;  %v773_v9 = vadd.f32 %v746_v61, %v733_v1  ;;  %v785_v28 = vmul.f32 %v783_v39, %v2136_v16  ;;  %v922_v49 = vpop.permute.xlu1 %921 }
 0x44b   :  { %1855 = vtanh.f32 %v798_v59  ;;  %v794_v19 = vadd.f32 %v786_v7, %v774_v4  ;;  %v772_v20 = vadd.f32 %v742_v6, %v732_v57  ;;  %v784_v2 = vmul.f32 %v783_v39, %v2143_v32 }
 0x44c   :  { %1857 = vtanh.f32 %v797_v25  ;;  %v793_v5 = vadd.f32 %v785_v28, %v773_v9  ;;  %v1950_v46 = vmov 6  }
 0x44d   :  { %1859 = vtanh.f32 %v796_v58  ;;  %v792_v40 = vadd.f32 %v784_v2, %v772_v20  ;;  %1783 = vset.pattern.permute.xlu0 %v1950_v46  ;;  %1784 = vset.pattern.permute.xlu1 %v1950_v46 }
 0x44e   :  { %1861 = vtanh.f32 %v795_v8  ;;  %1073 = vperm.xlu0 %1783, %v2357_v34   ;;  %1069 = vperm.xlu1 %1784, %v2363_v47  }
 0x44f   :  { %1863 = vtanh.f32 %v794_v19 }
 0x450   :  { %1865 = vtanh.f32 %v793_v5 }
 0x451   :  { %1867 = vtanh.f32 %v792_v40 }
 0x452   :  { %1061 = vperm.xlu0 %1783, %v2022_v13   ;;  %1065 = vperm.xlu1 %1784, %v2370_v27   ;;  %v914_v13 = vpop.permute.xlu1 %913 }
 0x456   :  { %1053 = vperm.xlu0 %1783, %v2034_v15   ;;  %1057 = vperm.xlu1 %1784, %v2028_v14   ;;  %v918_v15 = vpop.permute.xlu0 %917  ;;  %v910_v59 = vpop.permute.xlu1 %909 }
 0x457   :  { %v1854_v54 = vpop.eup %1853 }
 0x458   :  { %1659 = vmatpush3.msra.mxu0 %v1854_v54  ;;  %v1856_v10 = vpop.eup %1855 }
 0x459   :  { %1660 = vmatprep.subr.mxu0 %v1944_v11  ;;  %v1858_v55 = vpop.eup %1857 }
 0x45a   :  { %1661 = vmatpush3.msra.mxu0 %v1856_v10  ;;  %v1860_v42 = vpop.eup %1859  ;;  %1045 = vperm.xlu0 %1783, %v2051_v18   ;;  %v906_v1 = vpop.permute.xlu0 %905 }
 0x45b   :  { %1662 = vmatprep.subr.mxu0 %v1944_v11  ;;  %v1862_v39 = vpop.eup %1861  ;;  %1049 = vperm.xlu1 %1784, %v2044_v17   ;;  %v902_v9 = vpop.permute.xlu1 %901 }
 0x45c   :  { %1663 = vmatpush3.msra.mxu0 %v1858_v55  ;;  %v1864_v43 = vpop.eup %1863 }
 0x45d   :  { %1664 = vmatprep.subr.mxu0 %v1944_v11  ;;  %v1866_v33 = vpop.eup %1865 }
 0x45e   :  { %1665 = vmatpush3.msra.mxu0 %v1860_v42  ;;  %v1868_v44 = vpop.eup %1867  ;;  %v898_v40 = vpop.permute.xlu0 %897 }
 0x45f   :  { %1666 = vmatprep.subr.mxu0 %v1944_v11 }
 0x460   :  { %1667 = vmatpush3.msra.mxu0 %v1862_v39 }
 0x461   :  { %1668 = vmatprep.subr.mxu0 %v1944_v11 }
 0x462   :  { %1669 = vmatpush3.msra.mxu0 %v1864_v43 }
 0x463   :  { %1670 = vmatprep.subr.mxu0 %v1944_v11 }
 0x464   :  { %1671 = vmatpush3.msra.mxu0 %v1866_v33  ;;  %v894_v33 = vpop.permute.xlu1 %893 }
 0x465   :  { %1672 = vmatprep.subr.mxu0 %v1944_v11 }
 0x466   :  { %1673 = vmatpush3.msra.mxu0 %v1868_v44 }
 0x467   :  { %1675 = vmatmul.mubr.msk.f32.vlgmr.msra.gmra.mxu0 %vm195_vm1, %v2155_v24  ;;  %1696 = vmatprep.subr.mxu0 %v1944_v11 }
 0x468   :  { %1712 = vmatprep.mubr.msk.f32.mxu0 %vm1945_vm0, %v1944_v11 }
 0x527   :  { %v874_v50 = vpop.f32.mrf.mxu0 }
 0x528   :  { %v2378_v51 = vadd.f32 %v874_v50, %v2315_v31 }
 0x529   :  { %v1676_v53 = vpop.f32.mrf.mxu0 }
 0x52a   :  { %879 = vst.msk [vmem:[%s2586_s4 + $0x8] sm:$0x3] %vm270_vm2, %v2378_v51  ;;  %v883_v14 = vrot.slane %v2378_v51, %v2064_v21  ;;  %v935_v17 = vrot.slane %v2378_v51, %v2071_v23 }
 0x52c   :  { %v890_v18 = vmul.f32 %v883_v14, %v2087_v30  ;;  %v891_v31 = vmul.f32 %v883_v14, %v2077_v26  ;;  %v889_v56 = vmul.f32 %v883_v14, %v2091_v35  ;;  %v888_v62 = vmul.f32 %v883_v14, %v2095_v37 }
 0x52d   :  { %v943_v0 = vmul.f32 %v935_v17, %v2085_v29  ;;  %v942_v61 = vmul.f32 %v935_v17, %v2101_v41  ;;  %v887_v4 = vmul.f32 %v883_v14, %v2105_v45  ;;  %v886_v57 = vmul.f32 %v883_v14, %v2093_v36 }
 0x52e   :  { %v931_v22 = vadd.f32 %v922_v49, %v891_v31  ;;  %v930_v25 = vadd.f32 %v918_v15, %v890_v18  ;;  %v929_v3 = vadd.f32 %v914_v13, %v889_v56  ;;  %v928_v6 = vadd.f32 %v910_v59, %v888_v62 }
 0x52f   :  { %v941_v7 = vmul.f32 %v935_v17, %v2110_v48  ;;  %v940_v19 = vmul.f32 %v935_v17, %v2114_v52  ;;  %v927_v28 = vadd.f32 %v906_v1, %v887_v4  ;;  %v885_v2 = vmul.f32 %v883_v14, %v2097_v38  ;;  %v2441_v1 = vld [vmem:[%s2582_s2 + $0x10] sm:$0xff] }
 0x530   :  { %v951_v58 = vadd.f32 %v943_v0, %v931_v22  ;;  %v950_v8 = vadd.f32 %v942_v61, %v930_v25  ;;  %v926_v5 = vadd.f32 %v902_v9, %v886_v57  ;;  %v939_v10 = vmul.f32 %v935_v17, %v2122_v60  ;;  %v2423_v25 = vld [vmem:[%s2582_s2 + $0x18] sm:$0xff]  ;;  %v2435_v0 = vld [vmem:[%s2582_s2 + $0x8] sm:$0xff]  ;;  %v1070_v61 = vpop.permute.xlu1 %1069 }
 0x531   :  { %v949_v20 = vadd.f32 %v941_v7, %v929_v3  ;;  %v948_v54 = vadd.f32 %v940_v19, %v928_v6  ;;  %v884_v55 = vmul.f32 %v883_v14, %v2133_v12  ;;  %v938_v42 = vmul.f32 %v935_v17, %v2126_v63  ;;  %v2447_v3 = vld [vmem:[%s2582_s2] sm:$0xff] }
 0x532   :  { %1869 = vtanh.f32 %v951_v58  ;;  %v947_v39 = vadd.f32 %v939_v10, %v927_v28  ;;  %v925_v43 = vadd.f32 %v898_v40, %v885_v2  ;;  %v937_v49 = vmul.f32 %v935_v17, %v2136_v16  ;;  %v1074_v58 = vpop.permute.xlu0 %1073 }
 0x533   :  { %1871 = vtanh.f32 %v950_v8  ;;  %v946_v44 = vadd.f32 %v938_v42, %v926_v5  ;;  %v924_v46 = vadd.f32 %v894_v33, %v884_v55  ;;  %v936_v50 = vmul.f32 %v935_v17, %v2143_v32 }
 0x534   :  { %1873 = vtanh.f32 %v949_v20  ;;  %v945_v13 = vadd.f32 %v937_v49, %v925_v43  ;;  %v1951_v62 = vmov 7   ;;  %v1066_v7 = vpop.permute.xlu1 %1065 }
 0x535   :  { %1875 = vtanh.f32 %v948_v54  ;;  %v944_v53 = vadd.f32 %v936_v50, %v924_v46  ;;  %1785 = vset.pattern.permute.xlu1 %v1951_v62  ;;  %1786 = vset.pattern.permute.xlu0 %v1951_v62 }
 0x536   :  { %1877 = vtanh.f32 %v947_v39  ;;  %1225 = vperm.xlu1 %1785, %v2357_v34   ;;  %1221 = vperm.xlu0 %1786, %v2363_v47   ;;  %v1062_v19 = vpop.permute.xlu0 %1061 }
 0x537   :  { %1879 = vtanh.f32 %v946_v44 }
 0x538   :  { %1881 = vtanh.f32 %v945_v13  ;;  %v1058_v10 = vpop.permute.xlu1 %1057 }
 0x539   :  { %1883 = vtanh.f32 %v944_v53 }
 0x53a   :  { %1217 = vperm.xlu1 %1785, %v2370_v27   ;;  %1209 = vperm.xlu0 %1786, %v2423_v25   ;;  %v1054_v33 = vpop.permute.xlu0 %1053 }
 0x53e   :  { %1201 = vperm.xlu0 %1786, %v2435_v0  }
 0x53f   :  { %v1870_v15 = vpop.eup %1869 }
 0x540   :  { %1678 = vmatpush3.msra.mxu1 %v1870_v15  ;;  %v1872_v14 = vpop.eup %1871 }
 0x541   :  { %1679 = vmatprep.subr.mxu1 %v1944_v11  ;;  %v1874_v18 = vpop.eup %1873 }
 0x542   :  { %1680 = vmatpush3.msra.mxu1 %v1872_v14  ;;  %v1876_v31 = vpop.eup %1875 }
 0x543   :  { %1681 = vmatprep.subr.mxu1 %v1944_v11  ;;  %v1878_v17 = vpop.eup %1877 }
 0x544   :  { %1682 = vmatpush3.msra.mxu1 %v1874_v18  ;;  %v1880_v56 = vpop.eup %1879 }
 0x545   :  { %1683 = vmatprep.subr.mxu1 %v1944_v11  ;;  %v1882_v59 = vpop.eup %1881 }
 0x546   :  { %1684 = vmatpush3.msra.mxu1 %v1876_v31  ;;  %v1884_v22 = vpop.eup %1883  ;;  %v1050_v31 = vpop.permute.xlu1 %1049 }
 0x547   :  { %1685 = vmatprep.subr.mxu1 %v1944_v11 }
 0x548   :  { %1686 = vmatpush3.msra.mxu1 %v1878_v17 }
 0x549   :  { %1687 = vmatprep.subr.mxu1 %v1944_v11 }
 0x54a   :  { %1688 = vmatpush3.msra.mxu1 %v1880_v56 }
 0x54b   :  { %1689 = vmatprep.subr.mxu1 %v1944_v11 }
 0x54c   :  { %1690 = vmatpush3.msra.mxu1 %v1882_v59 }
 0x54d   :  { %1691 = vmatprep.subr.mxu1 %v1944_v11 }
 0x54e   :  { %1692 = vmatpush3.msra.mxu1 %v1884_v22  ;;  %v1046_v22 = vpop.permute.xlu0 %1045 }
 0x54f   :  { %1694 = vmatmul.mubr.msk.f32.vlgmr.msra.gmra.mxu1 %vm195_vm1, %v2155_v24  ;;  %1715 = vmatprep.subr.mxu1 %v1944_v11  ;;  %v2429_v24 = vld [vmem:[%s2582_s2 + $0x20] sm:$0xff] }
 0x550   :  { %1731 = vmatprep.mubr.msk.f32.mxu1 %vm1945_vm0, %v1944_v11  ;;  %1213 = vperm.xlu1 %1785, %v2429_v24  }
 0x554   :  { %1205 = vperm.xlu1 %1785, %v2441_v1  }
 0x558   :  { %1197 = vperm.xlu1 %1785, %v2447_v3  }
 0x60f   :  { %v1026_v4 = vpop.f32.mrf.mxu1 }
 0x610   :  { %v2451_v57 = vadd.f32 %v1026_v4, %v2378_v51 }
 0x611   :  { %v1695_v6 = vpop.f32.mrf.mxu1 }
 0x612   :  { %1031 = vst.msk [vmem:[%s2586_s4 + $0xa] sm:$0x3] %vm270_vm2, %v2451_v57  ;;  %v1035_v8 = vrot.slane %v2451_v57, %v2064_v21  ;;  %v1087_v9 = vrot.slane %v2451_v57, %v2071_v23 }
 0x614   :  { %v1042_v20 = vmul.f32 %v1035_v8, %v2087_v30  ;;  %v1043_v51 = vmul.f32 %v1035_v8, %v2077_v26  ;;  %v1041_v28 = vmul.f32 %v1035_v8, %v2091_v35  ;;  %v1040_v5 = vmul.f32 %v1035_v8, %v2095_v37 }
 0x615   :  { %v1095_v54 = vmul.f32 %v1087_v9, %v2085_v29  ;;  %v1094_v42 = vmul.f32 %v1087_v9, %v2101_v41  ;;  %v1039_v43 = vmul.f32 %v1035_v8, %v2105_v45  ;;  %v1093_v46 = vmul.f32 %v1087_v9, %v2110_v48 }
 0x616   :  { %v1083_v2 = vadd.f32 %v1074_v58, %v1043_v51  ;;  %v1082_v40 = vadd.f32 %v1070_v61, %v1042_v20  ;;  %v1081_v55 = vadd.f32 %v1066_v7, %v1041_v28  ;;  %v1080_v44 = vadd.f32 %v1062_v19, %v1040_v5 }
 0x617   :  { %v1038_v50 = vmul.f32 %v1035_v8, %v2093_v36  ;;  %v1092_v13 = vmul.f32 %v1087_v9, %v2114_v52  ;;  %v1079_v15 = vadd.f32 %v1058_v10, %v1039_v43  ;;  %v1037_v14 = vmul.f32 %v1035_v8, %v2097_v38 }
 0x618   :  { %v1103_v39 = vadd.f32 %v1095_v54, %v1083_v2  ;;  %v1102_v49 = vadd.f32 %v1094_v42, %v1082_v40  ;;  %v1101_v53 = vadd.f32 %v1093_v46, %v1081_v55  ;;  %v1091_v18 = vmul.f32 %v1087_v9, %v2122_v60  ;;  %v2488_v55 = vld [vmem:[%s2585_s3] sm:$0x3] }
 0x619   :  { %v1100_v17 = vadd.f32 %v1092_v13, %v1080_v44  ;;  %v1078_v56 = vadd.f32 %v1054_v33, %v1038_v50  ;;  %v1036_v59 = vmul.f32 %v1035_v8, %v2133_v12  ;;  %v1090_v62 = vmul.f32 %v1087_v9, %v2126_v63 }
 0x61a   :  { %1885 = vtanh.f32 %v1103_v39  ;;  %v1099_v61 = vadd.f32 %v1091_v18, %v1079_v15  ;;  %v1077_v58 = vadd.f32 %v1050_v31, %v1037_v14  ;;  %v1089_v7 = vmul.f32 %v1087_v9, %v2136_v16  ;;  %v1226_v39 = vpop.permute.xlu1 %1225 }
 0x61b   :  { %1887 = vtanh.f32 %v1102_v49  ;;  %v1098_v4 = vadd.f32 %v1090_v62, %v1078_v56  ;;  %v1076_v6 = vadd.f32 %v1046_v22, %v1036_v59  ;;  %v1088_v19 = vmul.f32 %v1087_v9, %v2143_v32 }
 0x61c   :  { %1889 = vtanh.f32 %v1101_v53  ;;  %v1097_v20 = vadd.f32 %v1089_v7, %v1077_v58  ;;  %v1952_v42 = vmov 8  }
 0x61d   :  { %1891 = vtanh.f32 %v1100_v17  ;;  %v1096_v51 = vadd.f32 %v1088_v19, %v1076_v6  ;;  %1787 = vset.pattern.permute.xlu0 %v1952_v42  ;;  %1788 = vset.pattern.permute.xlu1 %v1952_v42 }
 0x61e   :  { %1893 = vtanh.f32 %v1099_v61  ;;  %1377 = vperm.xlu0 %1787, %v2357_v34   ;;  %1373 = vperm.xlu1 %1788, %v2363_v47   ;;  %v1218_v34 = vpop.permute.xlu1 %1217 }
 0x61f   :  { %1895 = vtanh.f32 %v1098_v4 }
 0x620   :  { %1897 = vtanh.f32 %v1097_v20 }
 0x621   :  { %1899 = vtanh.f32 %v1096_v51 }
 0x622   :  { %1365 = vperm.xlu0 %1787, %v2429_v24   ;;  %1369 = vperm.xlu1 %1788, %v2370_v27   ;;  %v1222_v27 = vpop.permute.xlu0 %1221 }
 0x626   :  { %1357 = vperm.xlu0 %1787, %v2441_v1   ;;  %1361 = vperm.xlu1 %1788, %v2423_v25   ;;  %v1210_v13 = vpop.permute.xlu0 %1209 }
 0x627   :  { %v1886_v28 = vpop.eup %1885 }
 0x628   :  { %1697 = vmatpush3.msra.mxu0 %v1886_v28  ;;  %v1888_v8 = vpop.eup %1887 }
 0x629   :  { %1698 = vmatprep.subr.mxu0 %v1944_v11  ;;  %v1890_v2 = vpop.eup %1889 }
 0x62a   :  { %1699 = vmatpush3.msra.mxu0 %v1888_v8  ;;  %v1892_v5 = vpop.eup %1891  ;;  %1349 = vperm.xlu0 %1787, %v2447_v3   ;;  %v1214_v3 = vpop.permute.xlu1 %1213 }
 0x62b   :  { %1700 = vmatprep.subr.mxu0 %v1944_v11  ;;  %v1894_v9 = vpop.eup %1893  ;;  %1353 = vperm.xlu1 %1788, %v2435_v0   ;;  %v1202_v7 = vpop.permute.xlu0 %1201 }
 0x62c   :  { %1701 = vmatpush3.msra.mxu0 %v1890_v2  ;;  %v1896_v40 = vpop.eup %1895 }
 0x62d   :  { %1702 = vmatprep.subr.mxu0 %v1944_v11  ;;  %v1898_v54 = vpop.eup %1897 }
 0x62e   :  { %1703 = vmatpush3.msra.mxu0 %v1892_v5  ;;  %v1900_v10 = vpop.eup %1899  ;;  %v1206_v22 = vpop.permute.xlu1 %1205 }
 0x62f   :  { %1704 = vmatprep.subr.mxu0 %v1944_v11 }
 0x630   :  { %1705 = vmatpush3.msra.mxu0 %v1894_v9 }
 0x631   :  { %1706 = vmatprep.subr.mxu0 %v1944_v11 }
 0x632   :  { %1707 = vmatpush3.msra.mxu0 %v1896_v40  ;;  %v1198_v5 = vpop.permute.xlu1 %1197 }
 0x633   :  { %1708 = vmatprep.subr.mxu0 %v1944_v11 }
 0x634   :  { %1709 = vmatpush3.msra.mxu0 %v1898_v54 }
 0x635   :  { %1710 = vmatprep.subr.mxu0 %v1944_v11 }
 0x636   :  { %1711 = vmatpush3.msra.mxu0 %v1900_v10 }
 0x637   :  { %1713 = vmatmul.mubr.msk.f32.vlgmr.msra.gmra.mxu0 %vm195_vm1, %v2488_v55  ;;  %1734 = vmatprep.subr.mxu0 %v1944_v11 }
 0x638   :  { %1750 = vmatprep.mubr.msk.f32.mxu0 %vm1945_vm0, %v1944_v11 }
 0x6f7   :  { %v1178_v43 = vpop.f32.mrf.mxu0 }
 0x6f8   :  { %v2504_v33 = vadd.f32 %v1178_v43, %v2451_v57 }
 0x6f9   :  { %v1714_v44 = vpop.f32.mrf.mxu0 }
 0x6fa   :  { %1183 = vst.msk [vmem:[%s2586_s4 + $0xc] sm:$0x3] %vm270_vm2, %v2504_v33  ;;  %v1187_v47 = vrot.slane %v2504_v33, %v2064_v21  ;;  %v1239_v24 = vrot.slane %v2504_v33, %v2071_v23 }
 0x6fc   :  { %v1194_v25 = vmul.f32 %v1187_v47, %v2087_v30  ;;  %v1195_v0 = vmul.f32 %v1187_v47, %v2077_v26  ;;  %v1193_v1 = vmul.f32 %v1187_v47, %v2091_v35  ;;  %v1192_v46 = vmul.f32 %v1187_v47, %v2095_v37 }
 0x6fd   :  { %v1247_v50 = vmul.f32 %v1239_v24, %v2085_v29  ;;  %v1246_v15 = vmul.f32 %v1239_v24, %v2101_v41  ;;  %v1191_v18 = vmul.f32 %v1187_v47, %v2105_v45  ;;  %v1190_v31 = vmul.f32 %v1187_v47, %v2093_v36 }
 0x6fe   :  { %v1235_v57 = vadd.f32 %v1226_v39, %v1195_v0  ;;  %v1234_v49 = vadd.f32 %v1222_v27, %v1194_v25  ;;  %v1233_v53 = vadd.f32 %v1218_v34, %v1193_v1  ;;  %v1232_v17 = vadd.f32 %v1214_v3, %v1192_v46  ;;  %v1374_v1 = vpop.permute.xlu1 %1373  ;;  %v1378_v3 = vpop.permute.xlu0 %1377 }
 0x6ff   :  { %v1245_v56 = vmul.f32 %v1239_v24, %v2110_v48  ;;  %v1244_v62 = vmul.f32 %v1239_v24, %v2114_v52  ;;  %v1231_v58 = vadd.f32 %v1210_v13, %v1191_v18  ;;  %v1189_v4 = vmul.f32 %v1187_v47, %v2097_v38 }
 0x700   :  { %v1255_v14 = vadd.f32 %v1247_v50, %v1235_v57  ;;  %v1254_v59 = vadd.f32 %v1246_v15, %v1234_v49  ;;  %v1230_v6 = vadd.f32 %v1206_v22, %v1190_v31  ;;  %v1243_v20 = vmul.f32 %v1239_v24, %v2122_v60 }
 0x701   :  { %v1253_v61 = vadd.f32 %v1245_v56, %v1233_v53  ;;  %v1252_v19 = vadd.f32 %v1244_v62, %v1232_v17  ;;  %v1188_v51 = vmul.f32 %v1187_v47, %v2133_v12  ;;  %v1242_v28 = vmul.f32 %v1239_v24, %v2126_v63 }
 0x702   :  { %1901 = vtanh.f32 %v1255_v14  ;;  %v1251_v8 = vadd.f32 %v1243_v20, %v1231_v58  ;;  %v1229_v2 = vadd.f32 %v1202_v7, %v1189_v4  ;;  %v1241_v54 = vmul.f32 %v1239_v24, %v2136_v16  ;;  %v1370_v50 = vpop.permute.xlu1 %1369  ;;  %v1366_v15 = vpop.permute.xlu0 %1365 }
 0x703   :  { %1903 = vtanh.f32 %v1254_v59  ;;  %v1250_v9 = vadd.f32 %v1242_v28, %v1230_v6  ;;  %v1228_v40 = vadd.f32 %v1198_v5, %v1188_v51  ;;  %v1240_v10 = vmul.f32 %v1239_v24, %v2143_v32 }
 0x704   :  { %1905 = vtanh.f32 %v1253_v61  ;;  %v1249_v42 = vadd.f32 %v1241_v54, %v1229_v2 }
 0x705   :  { %1907 = vtanh.f32 %v1252_v19  ;;  %v1248_v39 = vadd.f32 %v1240_v10, %v1228_v40 }
 0x706   :  { %1909 = vtanh.f32 %v1251_v8  ;;  %v1362_v22 = vpop.permute.xlu1 %1361  ;;  %v1358_v58 = vpop.permute.xlu0 %1357 }
 0x707   :  { %1911 = vtanh.f32 %v1250_v9 }
 0x708   :  { %1913 = vtanh.f32 %v1249_v42 }
 0x709   :  { %1915 = vtanh.f32 %v1248_v39 }
 0x70a   :  { %v1350_v28 = vpop.permute.xlu0 %1349 }
 0x70f   :  { %v1902_v43 = vpop.eup %1901 }
 0x710   :  { %1716 = vmatpush3.msra.mxu1 %v1902_v43  ;;  %v1904_v34 = vpop.eup %1903 }
 0x711   :  { %1717 = vmatprep.subr.mxu1 %v1944_v11  ;;  %v1906_v44 = vpop.eup %1905 }
 0x712   :  { %1718 = vmatpush3.msra.mxu1 %v1904_v34  ;;  %v1908_v47 = vpop.eup %1907 }
 0x713   :  { %1719 = vmatprep.subr.mxu1 %v1944_v11  ;;  %v1910_v27 = vpop.eup %1909 }
 0x714   :  { %1720 = vmatpush3.msra.mxu1 %v1906_v44  ;;  %v1912_v25 = vpop.eup %1911 }
 0x715   :  { %1721 = vmatprep.subr.mxu1 %v1944_v11  ;;  %v1914_v24 = vpop.eup %1913 }
 0x716   :  { %1722 = vmatpush3.msra.mxu1 %v1908_v47  ;;  %v1916_v0 = vpop.eup %1915 }
 0x717   :  { %1723 = vmatprep.subr.mxu1 %v1944_v11 }
 0x718   :  { %1724 = vmatpush3.msra.mxu1 %v1910_v27 }
 0x719   :  { %1725 = vmatprep.subr.mxu1 %v1944_v11 }
 0x71a   :  { %1726 = vmatpush3.msra.mxu1 %v1912_v25 }
 0x71b   :  { %1727 = vmatprep.subr.mxu1 %v1944_v11 }
 0x71c   :  { %1728 = vmatpush3.msra.mxu1 %v1914_v24 }
 0x71d   :  { %1729 = vmatprep.subr.mxu1 %v1944_v11 }
 0x71e   :  { %1730 = vmatpush3.msra.mxu1 %v1916_v0 }
 0x71f   :  { %1732 = vmatmul.mubr.msk.f32.vlgmr.msra.gmra.mxu1 %vm195_vm1, %v2488_v55 }
 0x7df   :  { %v1330_v57 = vpop.f32.mrf.mxu1 }
 0x7e0   :  { %v2541_v46 = vadd.f32 %v1330_v57, %v2504_v33 }
 0x7e1   :  { %v1733_v49 = vpop.f32.mrf.mxu1 }
 0x7e2   :  { %1335 = vst.msk [vmem:[%s2586_s4 + $0xe] sm:$0x3] %vm270_vm2, %v2541_v46  ;;  %v1339_v13 = vrot.slane %v2541_v46, %v2064_v21  ;;  %v1391_v53 = vrot.slane %v2541_v46, %v2071_v23 }
 0x7e4   :  { %v1346_v14 = vmul.f32 %v1339_v13, %v2087_v30  ;;  %v1347_v33 = vmul.f32 %v1339_v13, %v2077_v26  ;;  %v1345_v18 = vmul.f32 %v1339_v13, %v2091_v35  ;;  %v1344_v17 = vmul.f32 %v1339_v13, %v2095_v37 }
 0x7e5   :  { %v1399_v59 = vmul.f32 %v1391_v53, %v2085_v29  ;;  %v1398_v21 = vmul.f32 %v1391_v53, %v2101_v41  ;;  %v1343_v23 = vmul.f32 %v1339_v13, %v2105_v45  ;;  %v1397_v30 = vmul.f32 %v1391_v53, %v2110_v48  ;;  %v1354_v41 = vpop.permute.xlu1 %1353 }
 0x7e6   :  { %v1387_v31 = vadd.f32 %v1378_v3, %v1347_v33  ;;  %v1386_v56 = vadd.f32 %v1374_v1, %v1346_v14  ;;  %v1385_v62 = vadd.f32 %v1370_v50, %v1345_v18  ;;  %v1384_v4 = vadd.f32 %v1366_v15, %v1344_v17 }
 0x7e7   :  { %v1342_v35 = vmul.f32 %v1339_v13, %v2093_v36  ;;  %v1396_v6 = vmul.f32 %v1391_v53, %v2114_v52  ;;  %v1383_v7 = vadd.f32 %v1362_v22, %v1343_v23  ;;  %v1341_v29 = vmul.f32 %v1339_v13, %v2097_v38 }
 0x7e8   :  { %v1407_v61 = vadd.f32 %v1399_v59, %v1387_v31  ;;  %v1406_v26 = vadd.f32 %v1398_v21, %v1386_v56  ;;  %v1405_v37 = vadd.f32 %v1397_v30, %v1385_v62  ;;  %v1395_v19 = vmul.f32 %v1391_v53, %v2122_v60 }
 0x7e9   :  { %v1404_v20 = vadd.f32 %v1396_v6, %v1384_v4  ;;  %v1382_v45 = vadd.f32 %v1358_v58, %v1342_v35  ;;  %v1340_v51 = vmul.f32 %v1339_v13, %v2133_v12  ;;  %v1394_v48 = vmul.f32 %v1391_v53, %v2126_v63 }
 0x7ea   :  { %1917 = vtanh.f32 %v1407_v61  ;;  %v1403_v36 = vadd.f32 %v1395_v19, %v1383_v7  ;;  %v1381_v8 = vadd.f32 %v1354_v41, %v1341_v29  ;;  %v1393_v5 = vmul.f32 %v1391_v53, %v2136_v16 }
 0x7eb   :  { %1919 = vtanh.f32 %v1406_v26  ;;  %v1402_v52 = vadd.f32 %v1394_v48, %v1382_v45  ;;  %v1380_v2 = vadd.f32 %v1350_v28, %v1340_v51  ;;  %v1392_v38 = vmul.f32 %v1391_v53, %v2143_v32 }
 0x7ec   :  { %1921 = vtanh.f32 %v1405_v37  ;;  %v1401_v60 = vadd.f32 %v1393_v5, %v1381_v8 }
 0x7ed   :  { %1923 = vtanh.f32 %v1404_v20  ;;  %v1400_v9 = vadd.f32 %v1392_v38, %v1380_v2 }
 0x7ee   :  { %1925 = vtanh.f32 %v1403_v36 }
 0x7ef   :  { %1927 = vtanh.f32 %v1402_v52 }
 0x7f0   :  { %1929 = vtanh.f32 %v1401_v60 }
 0x7f1   :  { %1931 = vtanh.f32 %v1400_v9 }
 0x7f7   :  { %v1918_v40 = vpop.eup %1917 }
 0x7f8   :  { %1735 = vmatpush3.msra.mxu0 %v1918_v40  ;;  %v1920_v12 = vpop.eup %1919 }
 0x7f9   :  { %1736 = vmatprep.subr.mxu0 %v1944_v11  ;;  %v1922_v63 = vpop.eup %1921 }
 0x7fa   :  { %1737 = vmatpush3.msra.mxu0 %v1920_v12  ;;  %v1924_v54 = vpop.eup %1923 }
 0x7fb   :  { %1738 = vmatprep.subr.mxu0 %v1944_v11  ;;  %v1926_v16 = vpop.eup %1925 }
 0x7fc   :  { %1739 = vmatpush3.msra.mxu0 %v1922_v63  ;;  %v1928_v32 = vpop.eup %1927 }
 0x7fd   :  { %1740 = vmatprep.subr.mxu0 %v1944_v11  ;;  %v1930_v10 = vpop.eup %1929 }
 0x7fe   :  { %1741 = vmatpush3.msra.mxu0 %v1924_v54  ;;  %v1932_v42 = vpop.eup %1931 }
 0x7ff   :  { %1742 = vmatprep.subr.mxu0 %v1944_v11 }
 0x800   :  { %1743 = vmatpush3.msra.mxu0 %v1926_v16 }
 0x801   :  { %1744 = vmatprep.subr.mxu0 %v1944_v11 }
 0x802   :  { %1745 = vmatpush3.msra.mxu0 %v1928_v32 }
 0x803   :  { %1746 = vmatprep.subr.mxu0 %v1944_v11 }
 0x804   :  { %1747 = vmatpush3.msra.mxu0 %v1930_v10 }
 0x805   :  { %1748 = vmatprep.subr.mxu0 %v1944_v11 }
 0x806   :  { %1749 = vmatpush3.msra.mxu0 %v1932_v42 }
 0x807   :  { %1751 = vmatmul.mubr.msk.f32.vlgmr.msra.gmra.mxu0 %vm195_vm1, %v2488_v55 }
 0x8c7   :  { %v1482_v39 = vpop.f32.mrf.mxu0 }
 0x8c8   :  { %v1486_v43 = vadd.f32 %v1482_v39, %v2541_v46 }
 0x8c9   :  { %v1752_v34 = vpop.f32.mrf.mxu0 }
 0x8ca   :  { %1487 = vst.msk [vmem:[%s2586_s4 + $0x10] sm:$0x3] %vm270_vm2, %v1486_v43 }

</bundles_post_ra>
